<compile_context>
chip_gen: v6e
topology: v6e:2x2x1
jax: 0.10.0
libtpu: 0.0.40
codegen_flags: <defaults>
</compile_context>

<pallas_src>
import functools

import jax
import jax.numpy as jnp
from jax.experimental import pallas as pl
from jax.experimental.pallas import tpu as pltpu


_LANE = 128  # aligned zero-halo width of the flattened-row scratch buffer


# --------------------------------------------------------------------------- kernel
def _amm_kernel(x_ref, dw_ref, w1_ref, spw_ref, cbw_ref, o_ref, xbuf_ref, *, H, W, K):
    """One image per grid step.  Everything is (C, H*W): C on sublanes, H*W on lanes."""
    C = x_ref.shape[1]
    HW = H * W
    pad = K // 2
    C16 = w1_ref.shape[0]

    # Build a lane-padded copy of the image in VMEM scratch (all three stores aligned):
    #   [ 128 zeros | image (HW) | 128 zeros ]
    # so each depthwise tap is a plain static-window ref load and any flattened-row
    # out-of-range position reads zero automatically.
    zpad = jnp.zeros((C, _LANE), jnp.float32)
    xbuf_ref[:, 0:_LANE] = zpad
    xbuf_ref[:, _LANE + HW:2 * _LANE + HW] = zpad
    xbuf_ref[:, _LANE:_LANE + HW] = x_ref[0]

    # column (j) index of every flattened position, used to zero W-border wrap-around
    p_idx = jax.lax.broadcasted_iota(jnp.int32, (1, HW), 1)
    col = (p_idx & (W - 1)) if (W & (W - 1)) == 0 else (p_idx % W)

    # ---- spatial branch: depthwise KxK conv, taps unrolled on the VPU ----
    acc = jnp.zeros((C, HW), jnp.float32)
    for di in range(K):
        for dj in range(K):
            s = (di - pad) * W + (dj - pad)
            win = xbuf_ref[:, _LANE + s:_LANE + s + HW]        # (C, HW) tap window
            d = dj - pad
            if d < 0:    # source column j+d < 0 wrapped from previous row -> zero it
                win = jnp.where(col >= -d, win, 0.0)
            elif d > 0:  # source column j+d >= W wrapped from next row -> zero it
                win = jnp.where(col < W - d, win, 0.0)
            w_tap = dw_ref[:, di * K + dj:di * K + dj + 1]     # (C, 1) per-channel tap
            acc = acc + win * w_tap
    y = acc + dw_ref[:, K * K:K * K + 1]                       # + depthwise bias (C, 1)

    # 1x1 conv (C -> C//16) with eval-mode BN folded in, then ReLU.
    # Single MXU pass with N = H*W lanes (dense) instead of N = C//16.
    h1 = jnp.dot(w1_ref[...], y, preferred_element_type=jnp.float32) + spw_ref[:, 0:1]
    h1 = jnp.maximum(h1, 0.0)                                  # (C16, HW)

    # 1x1 conv (C//16 -> 1) + sigmoid as a VPU multiply + sublane reduce: the width-1
    # spatial gate stays in vregs (no N=1 matmul, no masked 1-lane stores).
    s_val = jnp.sum(h1 * spw_ref[:, 1:2], axis=0, keepdims=True) + spw_ref[0:1, 2:3]
    spatial_gate = jax.nn.sigmoid(s_val)                       # (1, HW)

    # ---- channel branch (pure VPU/XLU): GAP -> 1x1 -> ReLU -> 1x1 -> sigmoid ----
    x = xbuf_ref[:, _LANE:_LANE + HW]                          # aligned reload of image
    pooled = jnp.sum(x, axis=1, keepdims=True) * (1.0 / HW)    # (C, 1)
    p1 = jnp.sum(cbw_ref[:, 0:C16] * pooled, axis=0, keepdims=True)           # (1, C16)
    p1 = jnp.maximum(p1, 0.0)
    channel_gate = jax.nn.sigmoid(
        jnp.sum(cbw_ref[:, C16:2 * C16] * p1, axis=1, keepdims=True))         # (C, 1)

    # ---- fused epilogue: sg*x + cg*x == x*(sg+cg); 128-lane dense (unmasked) store ----
    o_ref[0] = x * (spatial_gate + channel_gate)


# --------------------------------------------------------------------------- wrapper
def amm_forward(x_nchw, params, *, kernel_size=3, bn_eps=1e-5):
    B, C, H, W = x_nchw.shape
    K = kernel_size
    HW = H * W
    C16 = params['w1'].shape[0]

    # NCHW -> (B, C, H*W): free contiguous reshape (no transpose / pad HBM passes).
    x_flat = x_nchw.reshape(B, C, HW)

    # Fold eval-mode BatchNorm2d into the preceding 1x1 conv: (w x + b)*s + t
    bn_scale = params['bn_gamma'] * jax.lax.rsqrt(params['bn_var'] + bn_eps)
    bn_shift = params['bn_beta'] - params['bn_mean'] * bn_scale
    w1f = params['w1'] * bn_scale[:, None]                     # (C16, C)
    b1f = params['b1'] * bn_scale + bn_shift                   # (C16,)

    # Pack the small parameters to minimise per-step DMA descriptors.
    dw_all = jnp.concatenate([params['dw_w'], params['dw_b'][:, None]], axis=1)  # (C, K*K+1)
    spw = jnp.zeros((C16, 3), jnp.float32)
    spw = spw.at[:, 0].set(b1f).at[:, 1].set(params['w2']).at[0, 2].set(params['b2'])
    cbw = jnp.concatenate([params['wc1'].T, params['wc2']], axis=1)              # (C, 2*C16)

    out_flat = pl.pallas_call(
        functools.partial(_amm_kernel, H=H, W=W, K=K),
        grid=(B,),
        in_specs=[
            pl.BlockSpec((1, C, HW), lambda b: (b, 0, 0)),       # image, lane-dense
            pl.BlockSpec((C, K * K + 1), lambda b: (0, 0)),      # dw taps + bias
            pl.BlockSpec((C16, C), lambda b: (0, 0)),            # w1 (BN folded)
            pl.BlockSpec((C16, 3), lambda b: (0, 0)),            # [b1 | w2 | b2]
            pl.BlockSpec((C, 2 * C16), lambda b: (0, 0)),        # [wc1^T | wc2]
        ],
        out_specs=pl.BlockSpec((1, C, HW), lambda b: (b, 0, 0)),
        out_shape=jax.ShapeDtypeStruct((B, C, HW), jnp.float32),
        scratch_shapes=[pltpu.VMEM((C, 2 * _LANE + HW), jnp.float32)],
        compiler_params=pltpu.CompilerParams(dimension_semantics=("parallel",)),
    )(x_flat, dw_all, w1f, spw, cbw)

    return out_flat.reshape(B, C, H, W)


# --------------------------------------------------------------- pure-JAX reference
def amm_reference(x_nchw, params, *, kernel_size=3, bn_eps=1e-5):
    B, C, H, W = x_nchw.shape
    K = kernel_size
    pad = K // 2
    xp = jnp.pad(x_nchw, ((0, 0), (0, 0), (pad, pad), (pad, pad)))
    dw = params['dw_w'].reshape(C, K, K)
    acc = jnp.zeros_like(x_nchw)
    for di in range(K):
        for dj in range(K):
            acc = acc + xp[:, :, di:di + H, dj:dj + W] * dw[:, di, dj][None, :, None, None]
    acc = acc + params['dw_b'][None, :, None, None]
    z = jnp.einsum('oc,bchw->bohw', params['w1'], acc) + params['b1'][None, :, None, None]
    bn_scale = params['bn_gamma'] * jax.lax.rsqrt(params['bn_var'] + bn_eps)
    bn_shift = params['bn_beta'] - params['bn_mean'] * bn_scale
    h1 = jnp.maximum(z * bn_scale[None, :, None, None] + bn_shift[None, :, None, None], 0.0)
    s = jnp.einsum('o,bohw->bhw', params['w2'], h1) + params['b2']
    sg = jax.nn.sigmoid(s)[:, None, :, :]
    pooled = jnp.mean(x_nchw, axis=(2, 3))                        # (B, C)
    p1 = jnp.maximum(pooled @ params['wc1'].T, 0.0)               # (B, C16)
    cg = jax.nn.sigmoid(p1 @ params['wc2'].T)[:, :, None, None]   # (B, C)
    return x_nchw * sg + x_nchw * cg


# ----------------------------------------------------------------------- param init
def init_params(key, dim, kernel_size=3):
    C16 = dim // 16
    K = kernel_size
    ks = jax.random.split(key, 12)
    p = {}
    p['dw_w'] = 0.1 * jax.random.normal(ks[0], (dim, K * K), jnp.float32)   # (C, K*K), tap t = di*K+dj
    p['dw_b'] = 0.02 * jax.random.normal(ks[1], (dim,), jnp.float32)
    p['w1'] = 0.1 * jax.random.normal(ks[2], (C16, dim), jnp.float32)       # (out, in)
    p['b1'] = 0.02 * jax.random.normal(ks[3], (C16,), jnp.float32)
    p['bn_gamma'] = 1.0 + 0.1 * jax.random.normal(ks[4], (C16,), jnp.float32)
    p['bn_beta'] = 0.1 * jax.random.normal(ks[5], (C16,), jnp.float32)
    p['bn_mean'] = 0.1 * jax.random.normal(ks[6], (C16,), jnp.float32)
    p['bn_var'] = 1.0 + jnp.abs(0.1 * jax.random.normal(ks[7], (C16,), jnp.float32))
    p['w2'] = 0.1 * jax.random.normal(ks[8], (C16,), jnp.float32)           # C16 -> 1
    p['b2'] = 0.02 * jax.random.normal(ks[9], (), jnp.float32)
    p['wc1'] = 0.1 * jax.random.normal(ks[10], (C16, dim), jnp.float32)     # (out, in), bias=False
    p['wc2'] = 0.1 * jax.random.normal(ks[11], (dim, C16), jnp.float32)     # (out, in), bias=False
    return p


# ----------------------------------------------------------------------------- main
if __name__ == "__main__":
    B, dim, H, W = 2, 64, 16, 16          # AMM default dim=64 (dim // 16 = 4)

    key = jax.random.PRNGKey(0)
    kx, kp = jax.random.split(key)
    x = jax.random.normal(kx, (B, dim, H, W), jnp.float32)
    params = init_params(kp, dim)

    fwd = jax.jit(amm_forward)
    out = fwd(x, params)
    jax.block_until_ready(out)

    assert out.shape == (B, dim, H, W) and out.dtype == jnp.float32
    assert bool(jnp.all(jnp.isfinite(out)))

    ref = amm_reference(x, params)
    err = float(jnp.max(jnp.abs(out - ref)))
    assert err < 1e-4, f"max|err| = {err}"   # tightened from 5e-3 (all-f32 path)

    print("KERNEL_OK")
</pallas_src>

<mosaic_0001>
module attributes {stable_mosaic.version = 11 : i64} {
  func.func @_amm_kernel(%arg0: i32, %arg1: memref<1x64x256xf32, #tpu.memory_space<vmem>>, %arg2: memref<64x10xf32, #tpu.memory_space<vmem>>, %arg3: memref<4x64xf32, #tpu.memory_space<vmem>>, %arg4: memref<4x3xf32, #tpu.memory_space<vmem>>, %arg5: memref<64x8xf32, #tpu.memory_space<vmem>>, %arg6: memref<1x64x256xf32, #tpu.memory_space<vmem>>, %arg7: memref<64x512xf32, #tpu.memory_space<vmem>>) attributes {dimension_semantics = [#tpu.dimension_semantics<parallel>], iteration_bounds = array<i64: 2>, scalar_prefetch = 0 : i64, scratch_operands = 1 : i64, tpu.core_type = #tpu.core_type<tc>, window_params = [{transform_indices = @transform_0, window_bounds = array<i64: 1, 64, 256>}, {pipeline_mode = #tpu.pipeline_mode<synchronous>, transform_indices = @transform_1, window_bounds = array<i64: 64, 10>}, {pipeline_mode = #tpu.pipeline_mode<synchronous>, transform_indices = @transform_2, window_bounds = array<i64: 4, 64>}, {pipeline_mode = #tpu.pipeline_mode<synchronous>, transform_indices = @transform_3, window_bounds = array<i64: 4, 3>}, {pipeline_mode = #tpu.pipeline_mode<synchronous>, transform_indices = @transform_4, window_bounds = array<i64: 64, 8>}, {transform_indices = @transform_5, window_bounds = array<i64: 1, 64, 256>}]} {
    %cst = arith.constant 0.000000e+00 : f32
    %0 = vector.broadcast %cst : f32 to vector<64x128xf32>
    %c0 = arith.constant 0 : index
    %c0_0 = arith.constant 0 : index
    %1 = vector.load %arg7[%c0, %c0_0] : memref<64x512xf32, #tpu.memory_space<vmem>>, vector<64x128xf32>
    tpu.vector_store %arg7[%c0, %c0_0], %0 {strides = array<i32>} : memref<64x512xf32, #tpu.memory_space<vmem>>, vector<64x128xf32>,
    %c0_1 = arith.constant 0 : index
    %c384 = arith.constant 384 : index
    %2 = vector.load %arg7[%c0_1, %c384] : memref<64x512xf32, #tpu.memory_space<vmem>>, vector<64x128xf32>
    tpu.vector_store %arg7[%c0_1, %c384], %0 {strides = array<i32>} : memref<64x512xf32, #tpu.memory_space<vmem>>, vector<64x128xf32>,
    %c0_2 = arith.constant 0 : index
    %c0_3 = arith.constant 0 : index
    %c0_4 = arith.constant 0 : index
    %3 = vector.load %arg1[%c0_2, %c0_3, %c0_4] : memref<1x64x256xf32, #tpu.memory_space<vmem>>, vector<1x64x256xf32>
    %4 = vector.shape_cast %3 : vector<1x64x256xf32> to vector<64x256xf32>
    %c0_5 = arith.constant 0 : index
    %c128 = arith.constant 128 : index
    %5 = vector.load %arg7[%c0_5, %c128] : memref<64x512xf32, #tpu.memory_space<vmem>>, vector<64x256xf32>
    tpu.vector_store %arg7[%c0_5, %c128], %4 {strides = array<i32>} : memref<64x512xf32, #tpu.memory_space<vmem>>, vector<64x256xf32>,
    %6 = tpu.iota {dimensions = array<i32: 1>} : vector<1x256xi32>
    %c15_i32 = arith.constant 15 : i32
    %7 = vector.broadcast %c15_i32 : i32 to vector<1x256xi32>
    %8 = arith.andi %6, %7 : vector<1x256xi32>
    %cst_6 = arith.constant 0.000000e+00 : f32
    %9 = vector.broadcast %cst_6 : f32 to vector<64x256xf32>
    %c0_7 = arith.constant 0 : index
    %c111 = arith.constant 111 : index
    %10 = vector.load %arg7[%c0_7, %c111] : memref<64x512xf32, #tpu.memory_space<vmem>>, vector<64x256xf32>
    %c1_i32 = arith.constant 1 : i32
    %11 = vector.broadcast %c1_i32 : i32 to vector<1x256xi32>
    %12 = arith.cmpi sge, %8, %11 : vector<1x256xi32>
    %cst_8 = arith.constant 0.000000e+00 : f32
    %13 = vector.shape_cast %12 : vector<1x256xi1> to vector<1x256xi1>
    %14 = vector.broadcast %13 : vector<1x256xi1> to vector<64x256xi1>
    %15 = vector.broadcast %cst_8 : f32 to vector<64x256xf32>
    %16 = arith.select %14, %10, %15 : vector<64x256xi1>, vector<64x256xf32>
    %c0_9 = arith.constant 0 : index
    %c0_10 = arith.constant 0 : index
    %17 = vector.load %arg2[%c0_9, %c0_10] : memref<64x10xf32, #tpu.memory_space<vmem>>, vector<64x1xf32>
    %18 = vector.broadcast %17 : vector<64x1xf32> to vector<64x256xf32>
    %19 = arith.mulf %16, %18 : vector<64x256xf32>
    %20 = arith.addf %9, %19 : vector<64x256xf32>
    %c0_11 = arith.constant 0 : index
    %c112 = arith.constant 112 : index
    %21 = vector.load %arg7[%c0_11, %c112] : memref<64x512xf32, #tpu.memory_space<vmem>>, vector<64x256xf32>
    %c0_12 = arith.constant 0 : index
    %c1 = arith.constant 1 : index
    %22 = vector.load %arg2[%c0_12, %c1] : memref<64x10xf32, #tpu.memory_space<vmem>>, vector<64x1xf32>
    %23 = vector.broadcast %22 : vector<64x1xf32> to vector<64x256xf32>
    %24 = arith.mulf %21, %23 : vector<64x256xf32>
    %25 = arith.addf %20, %24 : vector<64x256xf32>
    %c0_13 = arith.constant 0 : index
    %c113 = arith.constant 113 : index
    %26 = vector.load %arg7[%c0_13, %c113] : memref<64x512xf32, #tpu.memory_space<vmem>>, vector<64x256xf32>
    %c15_i32_14 = arith.constant 15 : i32
    %27 = vector.broadcast %c15_i32_14 : i32 to vector<1x256xi32>
    %28 = arith.cmpi slt, %8, %27 : vector<1x256xi32>
    %cst_15 = arith.constant 0.000000e+00 : f32
    %29 = vector.shape_cast %28 : vector<1x256xi1> to vector<1x256xi1>
    %30 = vector.broadcast %29 : vector<1x256xi1> to vector<64x256xi1>
    %31 = vector.broadcast %cst_15 : f32 to vector<64x256xf32>
    %32 = arith.select %30, %26, %31 : vector<64x256xi1>, vector<64x256xf32>
    %c0_16 = arith.constant 0 : index
    %c2 = arith.constant 2 : index
    %33 = vector.load %arg2[%c0_16, %c2] : memref<64x10xf32, #tpu.memory_space<vmem>>, vector<64x1xf32>
    %34 = vector.broadcast %33 : vector<64x1xf32> to vector<64x256xf32>
    %35 = arith.mulf %32, %34 : vector<64x256xf32>
    %36 = arith.addf %25, %35 : vector<64x256xf32>
    %c0_17 = arith.constant 0 : index
    %c127 = arith.constant 127 : index
    %37 = vector.load %arg7[%c0_17, %c127] : memref<64x512xf32, #tpu.memory_space<vmem>>, vector<64x256xf32>
    %c1_i32_18 = arith.constant 1 : i32
    %38 = vector.broadcast %c1_i32_18 : i32 to vector<1x256xi32>
    %39 = arith.cmpi sge, %8, %38 : vector<1x256xi32>
    %cst_19 = arith.constant 0.000000e+00 : f32
    %40 = vector.shape_cast %39 : vector<1x256xi1> to vector<1x256xi1>
    %41 = vector.broadcast %40 : vector<1x256xi1> to vector<64x256xi1>
    %42 = vector.broadcast %cst_19 : f32 to vector<64x256xf32>
    %43 = arith.select %41, %37, %42 : vector<64x256xi1>, vector<64x256xf32>
    %c0_20 = arith.constant 0 : index
    %c3 = arith.constant 3 : index
    %44 = vector.load %arg2[%c0_20, %c3] : memref<64x10xf32, #tpu.memory_space<vmem>>, vector<64x1xf32>
    %45 = vector.broadcast %44 : vector<64x1xf32> to vector<64x256xf32>
    %46 = arith.mulf %43, %45 : vector<64x256xf32>
    %47 = arith.addf %36, %46 : vector<64x256xf32>
    %c0_21 = arith.constant 0 : index
    %c128_22 = arith.constant 128 : index
    %48 = vector.load %arg7[%c0_21, %c128_22] : memref<64x512xf32, #tpu.memory_space<vmem>>, vector<64x256xf32>
    %c0_23 = arith.constant 0 : index
    %c4 = arith.constant 4 : index
    %49 = vector.load %arg2[%c0_23, %c4] : memref<64x10xf32, #tpu.memory_space<vmem>>, vector<64x1xf32>
    %50 = vector.broadcast %49 : vector<64x1xf32> to vector<64x256xf32>
    %51 = arith.mulf %48, %50 : vector<64x256xf32>
    %52 = arith.addf %47, %51 : vector<64x256xf32>
    %c0_24 = arith.constant 0 : index
    %c129 = arith.constant 129 : index
    %53 = vector.load %arg7[%c0_24, %c129] : memref<64x512xf32, #tpu.memory_space<vmem>>, vector<64x256xf32>
    %c15_i32_25 = arith.constant 15 : i32
    %54 = vector.broadcast %c15_i32_25 : i32 to vector<1x256xi32>
    %55 = arith.cmpi slt, %8, %54 : vector<1x256xi32>
    %cst_26 = arith.constant 0.000000e+00 : f32
    %56 = vector.shape_cast %55 : vector<1x256xi1> to vector<1x256xi1>
    %57 = vector.broadcast %56 : vector<1x256xi1> to vector<64x256xi1>
    %58 = vector.broadcast %cst_26 : f32 to vector<64x256xf32>
    %59 = arith.select %57, %53, %58 : vector<64x256xi1>, vector<64x256xf32>
    %c0_27 = arith.constant 0 : index
    %c5 = arith.constant 5 : index
    %60 = vector.load %arg2[%c0_27, %c5] : memref<64x10xf32, #tpu.memory_space<vmem>>, vector<64x1xf32>
    %61 = vector.broadcast %60 : vector<64x1xf32> to vector<64x256xf32>
    %62 = arith.mulf %59, %61 : vector<64x256xf32>
    %63 = arith.addf %52, %62 : vector<64x256xf32>
    %c0_28 = arith.constant 0 : index
    %c143 = arith.constant 143 : index
    %64 = vector.load %arg7[%c0_28, %c143] : memref<64x512xf32, #tpu.memory_space<vmem>>, vector<64x256xf32>
    %c1_i32_29 = arith.constant 1 : i32
    %65 = vector.broadcast %c1_i32_29 : i32 to vector<1x256xi32>
    %66 = arith.cmpi sge, %8, %65 : vector<1x256xi32>
    %cst_30 = arith.constant 0.000000e+00 : f32
    %67 = vector.shape_cast %66 : vector<1x256xi1> to vector<1x256xi1>
    %68 = vector.broadcast %67 : vector<1x256xi1> to vector<64x256xi1>
    %69 = vector.broadcast %cst_30 : f32 to vector<64x256xf32>
    %70 = arith.select %68, %64, %69 : vector<64x256xi1>, vector<64x256xf32>
    %c0_31 = arith.constant 0 : index
    %c6 = arith.constant 6 : index
    %71 = vector.load %arg2[%c0_31, %c6] : memref<64x10xf32, #tpu.memory_space<vmem>>, vector<64x1xf32>
    %72 = vector.broadcast %71 : vector<64x1xf32> to vector<64x256xf32>
    %73 = arith.mulf %70, %72 : vector<64x256xf32>
    %74 = arith.addf %63, %73 : vector<64x256xf32>
    %c0_32 = arith.constant 0 : index
    %c144 = arith.constant 144 : index
    %75 = vector.load %arg7[%c0_32, %c144] : memref<64x512xf32, #tpu.memory_space<vmem>>, vector<64x256xf32>
    %c0_33 = arith.constant 0 : index
    %c7 = arith.constant 7 : index
    %76 = vector.load %arg2[%c0_33, %c7] : memref<64x10xf32, #tpu.memory_space<vmem>>, vector<64x1xf32>
    %77 = vector.broadcast %76 : vector<64x1xf32> to vector<64x256xf32>
    %78 = arith.mulf %75, %77 : vector<64x256xf32>
    %79 = arith.addf %74, %78 : vector<64x256xf32>
    %c0_34 = arith.constant 0 : index
    %c145 = arith.constant 145 : index
    %80 = vector.load %arg7[%c0_34, %c145] : memref<64x512xf32, #tpu.memory_space<vmem>>, vector<64x256xf32>
    %c15_i32_35 = arith.constant 15 : i32
    %81 = vector.broadcast %c15_i32_35 : i32 to vector<1x256xi32>
    %82 = arith.cmpi slt, %8, %81 : vector<1x256xi32>
    %cst_36 = arith.constant 0.000000e+00 : f32
    %83 = vector.shape_cast %82 : vector<1x256xi1> to vector<1x256xi1>
    %84 = vector.broadcast %83 : vector<1x256xi1> to vector<64x256xi1>
    %85 = vector.broadcast %cst_36 : f32 to vector<64x256xf32>
    %86 = arith.select %84, %80, %85 : vector<64x256xi1>, vector<64x256xf32>
    %c0_37 = arith.constant 0 : index
    %c8 = arith.constant 8 : index
    %87 = vector.load %arg2[%c0_37, %c8] : memref<64x10xf32, #tpu.memory_space<vmem>>, vector<64x1xf32>
    %88 = vector.broadcast %87 : vector<64x1xf32> to vector<64x256xf32>
    %89 = arith.mulf %86, %88 : vector<64x256xf32>
    %90 = arith.addf %79, %89 : vector<64x256xf32>
    %c0_38 = arith.constant 0 : index
    %c9 = arith.constant 9 : index
    %91 = vector.load %arg2[%c0_38, %c9] : memref<64x10xf32, #tpu.memory_space<vmem>>, vector<64x1xf32>
    %92 = vector.broadcast %91 : vector<64x1xf32> to vector<64x256xf32>
    %93 = arith.addf %90, %92 : vector<64x256xf32>
    %c0_39 = arith.constant 0 : index
    %c0_40 = arith.constant 0 : index
    %94 = vector.load %arg3[%c0_39, %c0_40] : memref<4x64xf32, #tpu.memory_space<vmem>>, vector<4x64xf32>
    %cst_41 = arith.constant dense<0.000000e+00> : vector<4x256xf32>
    %95 = tpu.matmul %94, %93, %cst_41 {dimension_numbers = #tpu.dot_dimension_numbers<[1], [0], [0], [1], [0, 0, 1, 1], [], []>} : vector<4x64xf32>, vector<64x256xf32>, vector<4x256xf32> -> vector<4x256xf32>
    %c0_42 = arith.constant 0 : index
    %c0_43 = arith.constant 0 : index
    %96 = vector.load %arg4[%c0_42, %c0_43] : memref<4x3xf32, #tpu.memory_space<vmem>>, vector<4x1xf32>
    %97 = vector.broadcast %96 : vector<4x1xf32> to vector<4x256xf32>
    %98 = arith.addf %95, %97 : vector<4x256xf32>
    %cst_44 = arith.constant 0.000000e+00 : f32
    %99 = vector.broadcast %cst_44 : f32 to vector<4x256xf32>
    %100 = arith.maximumf %98, %99 : vector<4x256xf32>
    %c0_45 = arith.constant 0 : index
    %c1_46 = arith.constant 1 : index
    %101 = vector.load %arg4[%c0_45, %c1_46] : memref<4x3xf32, #tpu.memory_space<vmem>>, vector<4x1xf32>
    %102 = vector.broadcast %101 : vector<4x1xf32> to vector<4x256xf32>
    %103 = arith.mulf %100, %102 : vector<4x256xf32>
    %cst_47 = arith.constant dense<0.000000e+00> : vector<256xf32>
    %104 = vector.multi_reduction <add>, %103, %cst_47 [0] : vector<4x256xf32> to vector<256xf32>
    %105 = vector.shape_cast %104 : vector<256xf32> to vector<1x256xf32>
    %c0_48 = arith.constant 0 : index
    %c2_49 = arith.constant 2 : index
    %106 = vector.load %arg4[%c0_48, %c2_49] : memref<4x3xf32, #tpu.memory_space<vmem>>, vector<1x1xf32>
    %107 = vector.broadcast %106 : vector<1x1xf32> to vector<1x256xf32>
    %108 = arith.addf %105, %107 : vector<1x256xf32>
    %109 = arith.negf %108 : vector<1x256xf32>
    %110 = math.exp %109 : vector<1x256xf32>
    %cst_50 = arith.constant 1.000000e+00 : f32
    %111 = vector.broadcast %cst_50 : f32 to vector<1x256xf32>
    %112 = arith.addf %111, %110 : vector<1x256xf32>
    %113 = arith.divf %111, %112 : vector<1x256xf32>
    %c0_51 = arith.constant 0 : index
    %c128_52 = arith.constant 128 : index
    %114 = vector.load %arg7[%c0_51, %c128_52] : memref<64x512xf32, #tpu.memory_space<vmem>>, vector<64x256xf32>
    %cst_53 = arith.constant dense<0.000000e+00> : vector<64xf32>
    %115 = vector.multi_reduction <add>, %114, %cst_53 [1] : vector<64x256xf32> to vector<64xf32>
    %116 = vector.shape_cast %115 : vector<64xf32> to vector<64x1xf32>
    %cst_54 = arith.constant 3.906250e-03 : f32
    %117 = vector.broadcast %cst_54 : f32 to vector<64x1xf32>
    %118 = arith.mulf %116, %117 : vector<64x1xf32>
    %c0_55 = arith.constant 0 : index
    %c0_56 = arith.constant 0 : index
    %119 = vector.load %arg5[%c0_55, %c0_56] : memref<64x8xf32, #tpu.memory_space<vmem>>, vector<64x4xf32>
    %120 = vector.broadcast %118 : vector<64x1xf32> to vector<64x4xf32>
    %121 = arith.mulf %119, %120 : vector<64x4xf32>
    %cst_57 = arith.constant dense<0.000000e+00> : vector<4xf32>
    %122 = vector.multi_reduction <add>, %121, %cst_57 [0] : vector<64x4xf32> to vector<4xf32>
    %123 = vector.shape_cast %122 : vector<4xf32> to vector<1x4xf32>
    %cst_58 = arith.constant 0.000000e+00 : f32
    %124 = vector.broadcast %cst_58 : f32 to vector<1x4xf32>
    %125 = arith.maximumf %123, %124 : vector<1x4xf32>
    %c0_59 = arith.constant 0 : index
    %c4_60 = arith.constant 4 : index
    %126 = vector.load %arg5[%c0_59, %c4_60] : memref<64x8xf32, #tpu.memory_space<vmem>>, vector<64x4xf32>
    %127 = vector.broadcast %125 : vector<1x4xf32> to vector<64x4xf32>
    %128 = arith.mulf %126, %127 : vector<64x4xf32>
    %cst_61 = arith.constant dense<0.000000e+00> : vector<64xf32>
    %129 = vector.multi_reduction <add>, %128, %cst_61 [1] : vector<64x4xf32> to vector<64xf32>
    %130 = vector.shape_cast %129 : vector<64xf32> to vector<64x1xf32>
    %131 = arith.negf %130 : vector<64x1xf32>
    %132 = math.exp %131 : vector<64x1xf32>
    %cst_62 = arith.constant 1.000000e+00 : f32
    %133 = vector.broadcast %cst_62 : f32 to vector<64x1xf32>
    %134 = arith.addf %133, %132 : vector<64x1xf32>
    %135 = arith.divf %133, %134 : vector<64x1xf32>
    %136 = vector.broadcast %113 : vector<1x256xf32> to vector<64x256xf32>
    %137 = vector.broadcast %135 : vector<64x1xf32> to vector<64x256xf32>
    %138 = arith.addf %136, %137 : vector<64x256xf32>
    %139 = arith.mulf %114, %138 : vector<64x256xf32>
    %c0_63 = arith.constant 0 : index
    %c0_64 = arith.constant 0 : index
    %c0_65 = arith.constant 0 : index
    %140 = vector.load %arg6[%c0_63, %c0_64, %c0_65] : memref<1x64x256xf32, #tpu.memory_space<vmem>>, vector<1x64x256xf32>
    %141 = vector.shape_cast %140 : vector<1x64x256xf32> to vector<64x256xf32>
    %142 = vector.shape_cast %139 : vector<64x256xf32> to vector<1x64x256xf32>
    tpu.vector_store %arg6[%c0_63, %c0_64, %c0_65], %142 {strides = array<i32>} : memref<1x64x256xf32, #tpu.memory_space<vmem>>, vector<1x64x256xf32>,
    return
  }
  func.func @transform_0(%arg0: i32) -> (i32, i32, i32) {
    %c0_i32 = arith.constant 0 : i32
    %c0_i32_0 = arith.constant 0 : i32
    %c0_i32_1 = arith.constant 0 : i32
    return %arg0, %c0_i32, %c0_i32_0 : i32, i32, i32
  }
  func.func @transform_1(%arg0: i32) -> (i32, i32) {
    %c0_i32 = arith.constant 0 : i32
    %c0_i32_0 = arith.constant 0 : i32
    %c0_i32_1 = arith.constant 0 : i32
    return %c0_i32, %c0_i32_0 : i32, i32
  }
  func.func @transform_2(%arg0: i32) -> (i32, i32) {
    %c0_i32 = arith.constant 0 : i32
    %c0_i32_0 = arith.constant 0 : i32
    %c0_i32_1 = arith.constant 0 : i32
    return %c0_i32, %c0_i32_0 : i32, i32
  }
  func.func @transform_3(%arg0: i32) -> (i32, i32) {
    %c0_i32 = arith.constant 0 : i32
    %c0_i32_0 = arith.constant 0 : i32
    %c0_i32_1 = arith.constant 0 : i32
    return %c0_i32, %c0_i32_0 : i32, i32
  }
  func.func @transform_4(%arg0: i32) -> (i32, i32) {
    %c0_i32 = arith.constant 0 : i32
    %c0_i32_0 = arith.constant 0 : i32
    %c0_i32_1 = arith.constant 0 : i32
    return %c0_i32, %c0_i32_0 : i32, i32
  }
  func.func @transform_5(%arg0: i32) -> (i32, i32, i32) {
    %c0_i32 = arith.constant 0 : i32
    %c0_i32_0 = arith.constant 0 : i32
    %c0_i32_1 = arith.constant 0 : i32
    return %arg0, %c0_i32, %c0_i32_0 : i32, i32, i32
  }
}

</mosaic_0001>

<bundles_post_ra>
// kernel: amm_forward.1
= control target key start
LH: loop header
LB: loop body
LE: loop exit
PB: predicated region body
PF: predicated region fallthrough
CT: control target
= control target key end

     0   :  { %s2594_s18 = smov 0   ;;  %s4517_s0 = inlined_call_operand.vmem [shape: f32[2,64,256], index: 0, kind: input, shape index: {}]   ;;  %s4518_s1 = inlined_call_operand.vmem [shape: f32[64,10], index: 1, kind: input, shape index: {}]   ;;  %s4519_s2 = inlined_call_operand.vmem [shape: f32[4,64], index: 2, kind: input, shape index: {}]   ;;  %s4520_s3 = inlined_call_operand.vmem [shape: f32[4,3], index: 3, kind: input, shape index: {}]   ;;  %s4521_s4 = inlined_call_operand.vmem [shape: f32[64,8], index: 4, kind: input, shape index: {}]   ;;  %s4522_s5 = inlined_call_operand.vmem [shape: f32[2,64,256], index: 5, kind: output, shape index: {}]  }
   0x1 LB: > { %s2257_s19 = sadd.s32 4294967295, %s2541_s18   ;;  %p2261_p0 = scmp.ge.s32.totalorder %s2541_s18, 1  ;;  %s2541_s18 = sphi %s2594_s18, %s15_s18  }
   0x2   : > { %p187_p1 = scmp.lt.s32.totalorder %s2541_s18, 3 }
   0x4   : > { %p188_p2 = pnand %p2261_p0, %p187_p1 }
   0x6   : > { %191 = sbr.rel (%p188_p2) target bundleno = 1443 (0x5a3), region = 40 }
   0xb   : > { %p215_p3 = scmp.lt.s32.totalorder %s2257_s19, 1  ;;  %v4525_v0 = vmov 0   ;;  %v4528_v1 = vmov 0.0   ;;  %s2545_s20 = smov 17   ;;  %v2704_v18 = vld [vmem:[%s4518_s1] sm:$0xff]  ;;  %v2712_v19 = vld [vmem:[%s4518_s1 + $0x8] sm:$0xff] }
   0xc   : > { %2330 = vset.pattern.permute.xlu0 %v4525_v0  ;;  %2331 = vset.pattern.permute.xlu1 %v4525_v0  ;;  %v2717_v20 = vld [vmem:[%s4518_s1 + $0x18] sm:$0xff]  ;;  %v2724_v21 = vld [vmem:[%s4518_s1 + $0x10] sm:$0xff]  ;;  %v2729_v22 = vld [vmem:[%s4518_s1 + $0x28] sm:$0xff]  ;;  %v4526_v26 = vmov 1   ;;  %s2547_s16 = smov 15   ;;  %v4523_v38 = vmov 2  }
   0xd   : > { %s4942_s19 = smov (!%p215_p3, %s2257_s19), 1  ;;  %1909 = vmatprep.mubr.f32.mxu0 %v4528_v1  ;;  %2311 = vrot.lane.b32.xlu0 %v4528_v1, %s2545_s20  ;;  %v2736_v23 = vld [vmem:[%s4518_s1 + $0x20] sm:$0xff]  ;;  %v2741_v24 = vld [vmem:[%s4518_s1 + $0x38] sm:$0xff]  ;;  %v2748_v25 = vld [vmem:[%s4518_s1 + $0x30] sm:$0xff]  ;;  %s2549_s17 = smov 16   ;;  %vm380_vm0 = vcmask 138240  }
   0xe   : > { %s2279_s21 = sshll.u32 %s4942_s19, 7  ;;  %s2553_s22 = smov 127   ;;  %vm740_vm1 = vcmask 121856   ;;  %vm901_vm4 = vcmask 7168   ;;  %vm637_vm6 = vcmask 130048   ;;  %vm1174_vm8 = vcmask 1039360  }
   0xf   : > { %s2615_s24 = scalar_lea.vmem %s4517_s0, %s2279_s21  ;;  %s2556_s23 = smov 113   ;;  %vm1335_vm9 = vcmask 924672   ;;  %vm1576_vm10 = vcmask 916480   ;;  %vm1673_vm11 = vcmask 908288   ;;  %vm2007_vm12 = vcmask 31744  }
  0x10   : > { %v2618_v2 = vld [vmem:[%s2615_s24 + $0x8] sm:$0xff]  ;;  %v2621_v3 = vld [vmem:[%s2615_s24] sm:$0xff]  ;;  %v2628_v4 = vld [vmem:[%s2615_s24 + $0x10] sm:$0xff]  ;;  %s2558_s25 = smov 111   ;;  %s2560_s26 = smov 112   ;;  %vm1841_vm13 = vcmask 523264  }
  0x11   : > { %336 = vrot.lane.b32.xlu1 %v2618_v2, %s2545_s20  ;;  %334 = vrot.lane.b32.xlu0 %v2621_v3, %s2545_s20  ;;  %v2631_v5 = vld [vmem:[%s2615_s24 + $0x18] sm:$0xff]  ;;  %v2638_v6 = vld [vmem:[%s2615_s24 + $0x20] sm:$0xff]  ;;  %s2562_s15 = smov 4   ;;  %vm1924_vm14 = vcmask 1043456   ;;  %s4480_s28 = scalar_lea.vmem %s4522_s5, %s2279_s21 }
  0x12   : > { %v2645_v7 = vld [vmem:[%s2615_s24 + $0x28] sm:$0xff]  ;;  %v2648_v8 = vld [vmem:[%s2615_s24 + $0x30] sm:$0xff]  ;;  %v2655_v9 = vld [vmem:[%s2615_s24 + $0x38] sm:$0xff] }
  0x13   : > { %v2662_v10 = vld [vmem:[%s2615_s24 + $0x40] sm:$0xff]  ;;  %v2665_v11 = vld [vmem:[%s2615_s24 + $0x48] sm:$0xff]  ;;  %v2672_v12 = vld [vmem:[%s2615_s24 + $0x50] sm:$0xff] }
  0x14   : > { %v2675_v13 = vld [vmem:[%s2615_s24 + $0x58] sm:$0xff]  ;;  %v2682_v14 = vld [vmem:[%s2615_s24 + $0x60] sm:$0xff]  ;;  %v2689_v15 = vld [vmem:[%s2615_s24 + $0x68] sm:$0xff] }
  0x15   : > { %340 = vrot.lane.b32.xlu1 %v2628_v4, %s2545_s20  ;;  %342 = vrot.lane.b32.xlu0 %v2631_v5, %s2545_s20  ;;  %v2692_v16 = vld [vmem:[%s2615_s24 + $0x70] sm:$0xff]  ;;  %v2699_v17 = vld [vmem:[%s2615_s24 + $0x78] sm:$0xff] }
  0x19   : > { %2316 = vrot.lane.b32.xlu1 %v4528_v1, %s2545_s20  ;;  %346 = vrot.lane.b32.xlu0 %v2638_v6, %s2545_s20 }
  0x1d   : > { %348 = vrot.lane.b32.xlu1 %v2645_v7, %s2545_s20  ;;  %352 = vrot.lane.b32.xlu0 %v2648_v8, %s2545_s20 }
  0x21   : > { %354 = vrot.lane.b32.xlu1 %v2655_v9, %s2545_s20  ;;  %2321 = vrot.lane.b32.xlu0 %v4528_v1, %s2545_s20 }
  0x25   : > { %358 = vrot.lane.b32.xlu1 %v2662_v10, %s2545_s20  ;;  %360 = vrot.lane.b32.xlu0 %v2665_v11, %s2545_s20 }
  0x29   : > { %364 = vrot.lane.b32.xlu1 %v2672_v12, %s2545_s20  ;;  %366 = vrot.lane.b32.xlu0 %v2675_v13, %s2545_s20 }
  0x2d   : > { %2326 = vrot.lane.b32.xlu1 %v4528_v1, %s2545_s20  ;;  %370 = vrot.lane.b32.xlu0 %v2682_v14, %s2545_s20 }
  0x31   : > { %372 = vrot.lane.b32.xlu1 %v2689_v15, %s2545_s20  ;;  %376 = vrot.lane.b32.xlu0 %v2692_v16, %s2545_s20 }
  0x35   : > { %378 = vrot.lane.b32.xlu1 %v2699_v17, %s2545_s20  ;;  %439 = vperm.xlu0 %2330, %v2704_v18   ;;  %s2550_s20 = smov 1  }
  0x39   : > { %444 = vperm.xlu1 %2331, %v2712_v19   ;;  %454 = vperm.xlu0 %2330, %v2717_v20  }
  0x3d   : > { %449 = vperm.xlu1 %2331, %v2724_v21   ;;  %464 = vperm.xlu0 %2330, %v2729_v22  }
  0x41   : > { %459 = vperm.xlu1 %2331, %v2736_v23   ;;  %474 = vperm.xlu0 %2330, %v2741_v24  }
  0x45   : > { %469 = vperm.xlu1 %2331, %v2748_v25   ;;  %2333 = vset.pattern.permute.xlu0 %v4526_v26 }
  0x46   : > { %514 = vperm.xlu0 %2333, %v2712_v19  }
  0x49   : > { %2332 = vset.pattern.permute.xlu1 %v4526_v26 }
  0x4a   : > { %510 = vperm.xlu1 %2332, %v2704_v18   ;;  %526 = vperm.xlu0 %2333, %v2736_v23  }
  0x4e   : > { %518 = vperm.xlu1 %2332, %v2724_v21   ;;  %534 = vperm.xlu0 %2333, %v2748_v25  }
  0x52   : > { %522 = vperm.xlu1 %2332, %v2717_v20   ;;  %2335 = vrot.lane.b32.xlu0 %v4528_v1, %s2547_s16 }
  0x53   : > { %2354 = vset.pattern.permute.xlu0 %v4523_v38 }
  0x56   : > { %530 = vperm.xlu1 %2332, %v2729_v22   ;;  %696 = vrot.lane.b32.xlu0 %v2618_v2, %s2547_s16 }
  0x5a   : > { %538 = vperm.xlu1 %2332, %v2741_v24  }
  0x5e   : > { %694 = vrot.lane.b32.xlu1 %v2621_v3, %s2547_s16 }
  0x5f   : > { %2355 = vset.pattern.permute.xlu1 %v4523_v38 }
  0x62   : > { %700 = vrot.lane.b32.xlu1 %v2628_v4, %s2547_s16 }
  0x7f   : > { %v2769_v27 = vpop.permute.xlu0 %2311 }
  0x80   : > { %4629 = vst [vmem:[#allocation3_spill] sm:$0xff] %v2769_v27 }
  0x83   : > { %v2771_v28 = vpop.permute.xlu1 %336  ;;  %v2773_v29 = vpop.permute.xlu0 %334 }
  0x84   : > { %4630 = vst [vmem:[#allocation4_spill] sm:$0xff] %v2771_v28  ;;  %4631 = vst [vmem:[#allocation5_spill] sm:$0xff] %v2773_v29 }
  0x87   : > { %v2775_v30 = vpop.permute.xlu1 %340  ;;  %v2777_v31 = vpop.permute.xlu0 %342 }
  0x88   : > { %4632 = vst [vmem:[#allocation6_spill] sm:$0xff] %v2775_v30  ;;  %4633 = vst [vmem:[#allocation7_spill] sm:$0xff] %v2777_v31 }
  0x8b   : > { %v2779_v32 = vpop.permute.xlu1 %2316  ;;  %v2781_v33 = vpop.permute.xlu0 %346 }
  0x8c   : > { %4634 = vst [vmem:[#allocation8_spill] sm:$0xff] %v2779_v32  ;;  %4635 = vst [vmem:[#allocation9_spill] sm:$0xff] %v2781_v33  ;;  %v4679_v33 = vmov 0.0   ;;  %v2559_v32 = vmov 6  }
  0x8f   : > { %v2783_v34 = vpop.permute.xlu1 %348  ;;  %v2785_v35 = vpop.permute.xlu0 %352 }
  0x90   : > { %4636 = vst [vmem:[#allocation10_spill] sm:$0xff] %v2783_v34  ;;  %4637 = vst [vmem:[#allocation11_spill] sm:$0xff] %v2785_v35 }
  0x93   : > { %v2787_v36 = vpop.permute.xlu1 %354  ;;  %v2789_v37 = vpop.permute.xlu0 %2321 }
  0x94   : > { %4638 = vst [vmem:[#allocation12_spill] sm:$0xff] %v2787_v36 }
  0x97   : > { %v2793_v39 = vpop.permute.xlu1 %358  ;;  %v2795_v40 = vpop.permute.xlu0 %360 }
  0x98   : > { %4639 = vst [vmem:[#allocation13_spill] sm:$0xff] %v2795_v40 }
  0x9b   : > { %v2797_v41 = vpop.permute.xlu1 %364  ;;  %v2799_v42 = vpop.permute.xlu0 %366 }
  0x9f   : > { %v2801_v43 = vpop.permute.xlu1 %2326  ;;  %v2803_v44 = vpop.permute.xlu0 %370 }
  0xa0   : > { %4640 = vst [vmem:[#allocation14_spill] sm:$0xff] %v2801_v43 }
  0xa3   : > { %v2805_v45 = vpop.permute.xlu1 %372  ;;  %v2807_v46 = vpop.permute.xlu0 %376 }
  0xa4   : > { %4641 = vst [vmem:[#allocation15_spill] sm:$0xff] %v2807_v46 }
  0xa7   : > { %v2809_v47 = vpop.permute.xlu1 %378 }
  0xa8   : > { %4642 = vst [vmem:[#allocation16_spill] sm:$0xff] %v2809_v47 }
  0xb0   : > { %v2811_v48 = vpop.permute.xlu0 %439 }
  0xb1   : > { %4643 = vst [vmem:[#allocation17_spill] sm:$0xff] %v2811_v48 }
  0xb4   : > { %v2813_v49 = vpop.permute.xlu1 %444  ;;  %v2815_v50 = vpop.permute.xlu0 %454 }
  0xb5   : > { %4644 = vst [vmem:[#allocation18_spill] sm:$0xff] %v2813_v49  ;;  %4645 = vst [vmem:[#allocation19_spill] sm:$0xff] %v2815_v50 }
  0xb8   : > { %v2817_v51 = vpop.permute.xlu1 %449  ;;  %v2821_v53 = vpop.permute.xlu0 %464 }
  0xb9   : > { %4646 = vst [vmem:[#allocation20_spill] sm:$0xff] %v2817_v51 }
  0xbc   : > { %v2819_v52 = vpop.permute.xlu1 %459  ;;  %v2825_v55 = vpop.permute.xlu0 %474 }
  0xbd   : > { %4647 = vst [vmem:[#allocation21_spill] sm:$0xff] %v2819_v52  ;;  %4648 = vst [vmem:[#allocation22_spill] sm:$0xff] %v2825_v55 }
  0xc0   : > { %v2823_v54 = vpop.permute.xlu1 %469 }
  0xc1   : > { %v515_v59 = vpop.permute.xlu0 %514 }
  0xc2   : > { %v544_v60 = vmul.f32 0.0, %v515_v59  ;;  %v545_v62 = vmul.f32 %v515_v59, %v2628_v4  ;;  %v546_v63 = vmul.f32 %v515_v59, %v2631_v5 }
  0xc5   : > { %v511_v56 = vpop.permute.xlu1 %510 }
  0xc6   : > { %v541_v57 = vmul.f32 0.0, %v511_v56  ;;  %v542_v58 = vmul.f32 %v511_v56, %v2621_v3  ;;  %v543_v61 = vmul.f32 %v511_v56, %v2618_v2 }
  0xc8   : > { %589 = vrot.lane.b32.xlu0 %v541_v57, %s2549_s17  ;;  %591 = vrot.lane.b32.xlu1 %v542_v58, %s2549_s17 }
  0xc9   : > { %v519_v38 = vpop.permute.xlu1 %518 }
  0xca   : > { %v547_v0 = vmul.f32 0.0, %v519_v38  ;;  %v548_v57 = vmul.f32 %v519_v38, %v2638_v6  ;;  %v549_v56 = vmul.f32 %v519_v38, %v2645_v7 }
  0xcc   : > { %593 = vrot.lane.b32.xlu0 %v543_v61, %s2549_s17  ;;  %595 = vrot.lane.b32.xlu1 %v544_v60, %s2549_s17 }
  0xcd   : > { %v523_v58 = vpop.permute.xlu1 %522 }
  0xce   : > { %v550_v60 = vmul.f32 0.0, %v523_v58  ;;  %v551_v59 = vmul.f32 %v523_v58, %v2648_v8  ;;  %v552_v61 = vmul.f32 %v523_v58, %v2655_v9 }
  0xd0   : > { %597 = vrot.lane.b32.xlu0 %v545_v62, %s2549_s17  ;;  %599 = vrot.lane.b32.xlu1 %v546_v63, %s2549_s17  ;;  %v527_v62 = vpop.permute.xlu0 %526 }
  0xd1   : > { %v553_v63 = vmul.f32 0.0, %v527_v62  ;;  %v555_v38 = vmul.f32 %v527_v62, %v2665_v11 }
  0xd4   : > { %601 = vrot.lane.b32.xlu0 %v547_v0, %s2549_s17  ;;  %603 = vrot.lane.b32.xlu1 %v548_v57, %s2549_s17  ;;  %v554_v0 = vmul.f32 %v527_v62, %v2662_v10  ;;  %v531_v57 = vpop.permute.xlu1 %530 }
  0xd5   : > { %v557_v58 = vmul.f32 %v531_v57, %v2672_v12 }
  0xd8   : > { %605 = vrot.lane.b32.xlu0 %v549_v56, %s2549_s17  ;;  %607 = vrot.lane.b32.xlu1 %v550_v60, %s2549_s17  ;;  %v556_v56 = vmul.f32 0.0, %v531_v57  ;;  %v558_v60 = vmul.f32 %v531_v57, %v2675_v13 }
  0xdc   : > { %609 = vrot.lane.b32.xlu0 %v551_v59, %s2549_s17  ;;  %611 = vrot.lane.b32.xlu1 %v552_v61, %s2549_s17  ;;  %v535_v59 = vpop.permute.xlu0 %534 }
  0xdd   : > { %v559_v61 = vmul.f32 0.0, %v535_v59  ;;  %v561_v62 = vmul.f32 %v535_v59, %v2689_v15 }
  0xe0   : > { %613 = vrot.lane.b32.xlu0 %v553_v63, %s2549_s17  ;;  %615 = vrot.lane.b32.xlu1 %v554_v0, %s2549_s17  ;;  %v560_v63 = vmul.f32 %v535_v59, %v2682_v14  ;;  %v539_v0 = vpop.permute.xlu1 %538 }
  0xe1   : > { %v563_v57 = vmul.f32 %v539_v0, %v2692_v16 }
  0xe4   : > { %617 = vrot.lane.b32.xlu0 %v555_v38, %s2549_s17  ;;  %619 = vrot.lane.b32.xlu1 %v556_v56, %s2549_s17  ;;  %v562_v38 = vmul.f32 0.0, %v539_v0  ;;  %v564_v56 = vmul.f32 %v539_v0, %v2699_v17  ;;  %v2917_v59 = vpop.permute.xlu1 %694 }
  0xe5   : > { %4650 = vst [vmem:[#allocation24_spill] sm:$0xff] %v2917_v59 }
  0xe8   : > { %621 = vrot.lane.b32.xlu0 %v557_v58, %s2549_s17  ;;  %623 = vrot.lane.b32.xlu1 %v558_v60, %s2549_s17  ;;  %v2551_v58 = vmov 3   ;;  %v2915_v60 = vpop.permute.xlu0 %2335 }
  0xe9   : > { %4649 = vst [vmem:[#allocation23_spill] sm:$0xff] %v2915_v60 }
  0xec   : > { %625 = vrot.lane.b32.xlu0 %v559_v61, %s2549_s17  ;;  %627 = vrot.lane.b32.xlu1 %v560_v63, %s2549_s17  ;;  %v2927_v61 = vpop.permute.xlu0 %696  ;;  %v2929_v63 = vpop.permute.xlu1 %700 }
  0xed   : > { %4651 = vst [vmem:[#allocation25_spill] sm:$0xff] %v2927_v61  ;;  %4652 = vst [vmem:[#allocation26_spill] sm:$0xff] %v2929_v63  ;;  %v2552_v63 = vmov 4  }
  0xf0   : > { %629 = vrot.lane.b32.xlu0 %v561_v62, %s2549_s17  ;;  %631 = vrot.lane.b32.xlu1 %v562_v38, %s2549_s17 }
  0xf4   : > { %633 = vrot.lane.b32.xlu0 %v563_v57, %s2549_s17  ;;  %635 = vrot.lane.b32.xlu1 %v564_v56, %s2549_s17 }
  0xf8   : > { %702 = vrot.lane.b32.xlu0 %v2631_v5, %s2547_s16  ;;  %2340 = vrot.lane.b32.xlu1 %v4528_v1, %s2547_s16 }
  0xfc   : > { %706 = vrot.lane.b32.xlu0 %v2638_v6, %s2547_s16  ;;  %708 = vrot.lane.b32.xlu1 %v2645_v7, %s2547_s16 }
 0x100   : > { %712 = vrot.lane.b32.xlu0 %v2648_v8, %s2547_s16  ;;  %714 = vrot.lane.b32.xlu1 %v2655_v9, %s2547_s16 }
 0x104   : > { %2345 = vrot.lane.b32.xlu0 %v4528_v1, %s2547_s16  ;;  %718 = vrot.lane.b32.xlu1 %v2662_v10, %s2547_s16 }
 0x108   : > { %720 = vrot.lane.b32.xlu0 %v2665_v11, %s2547_s16  ;;  %724 = vrot.lane.b32.xlu1 %v2672_v12, %s2547_s16 }
 0x10c   : > { %726 = vrot.lane.b32.xlu0 %v2675_v13, %s2547_s16  ;;  %2350 = vrot.lane.b32.xlu1 %v4528_v1, %s2547_s16 }
 0x110   : > { %730 = vrot.lane.b32.xlu0 %v2682_v14, %s2547_s16  ;;  %732 = vrot.lane.b32.xlu1 %v2689_v15, %s2547_s16 }
 0x114   : > { %736 = vrot.lane.b32.xlu0 %v2692_v16, %s2547_s16  ;;  %738 = vrot.lane.b32.xlu1 %v2699_v17, %s2547_s16  ;;  %s2563_s16 = smov 124  }
 0x118   : > { %790 = vperm.xlu0 %2354, %v2704_v18   ;;  %794 = vperm.xlu1 %2355, %v2712_v19  }
 0x11c   : > { %802 = vperm.xlu0 %2354, %v2717_v20   ;;  %798 = vperm.xlu1 %2355, %v2724_v21  }
 0x120   : > { %810 = vperm.xlu0 %2354, %v2729_v22   ;;  %806 = vperm.xlu1 %2355, %v2736_v23  }
 0x124   : > { %818 = vperm.xlu0 %2354, %v2741_v24   ;;  %814 = vperm.xlu1 %2355, %v2748_v25  }
 0x128   : > { %855 = vrot.lane.b32.xlu0 %v2621_v3, %s2550_s20  ;;  %2357 = vrot.lane.b32.xlu1 %v4528_v1, %s2550_s20 }
 0x129   : > { %2377 = vset.pattern.permute.xlu0 %v2551_v58  ;;  %2376 = vset.pattern.permute.xlu1 %v2551_v58 }
 0x12c   : > { %861 = vrot.lane.b32.xlu0 %v2628_v4, %s2550_s20  ;;  %857 = vrot.lane.b32.xlu1 %v2618_v2, %s2550_s20 }
 0x130   : > { %2362 = vrot.lane.b32.xlu0 %v4528_v1, %s2550_s20  ;;  %863 = vrot.lane.b32.xlu1 %v2631_v5, %s2550_s20 }
 0x134   : > { %869 = vrot.lane.b32.xlu0 %v2645_v7, %s2550_s20  ;;  %867 = vrot.lane.b32.xlu1 %v2638_v6, %s2550_s20 }
 0x138   : > { %875 = vrot.lane.b32.xlu0 %v2655_v9, %s2550_s20  ;;  %873 = vrot.lane.b32.xlu1 %v2648_v8, %s2550_s20 }
 0x13a   : > { %v2935_v0 = vpop.permute.xlu0 %589  ;;  %v2937_v62 = vpop.permute.xlu1 %591 }
 0x13b   : > { %4653 = vst [vmem:[#allocation27_spill] sm:$0xff] %v2935_v0  ;;  %4654 = vst [vmem:[#allocation28_spill] sm:$0xff] %v2937_v62 }
 0x13c   : > { %879 = vrot.lane.b32.xlu0 %v2662_v10, %s2550_s20  ;;  %2367 = vrot.lane.b32.xlu1 %v4528_v1, %s2550_s20 }
 0x13e   : > { %v2943_v38 = vpop.permute.xlu0 %593  ;;  %v2945_v57 = vpop.permute.xlu1 %595 }
 0x13f   : > { %4655 = vst [vmem:[#allocation29_spill] sm:$0xff] %v2943_v38  ;;  %4656 = vst [vmem:[#allocation30_spill] sm:$0xff] %v2945_v57 }
 0x140   : > { %885 = vrot.lane.b32.xlu0 %v2672_v12, %s2550_s20  ;;  %881 = vrot.lane.b32.xlu1 %v2665_v11, %s2550_s20 }
 0x142   : > { %v2951_v56 = vpop.permute.xlu0 %597  ;;  %v2953_v58 = vpop.permute.xlu1 %599 }
 0x143   : > { %4657 = vst [vmem:[#allocation31_spill] sm:$0xff] %v2951_v56  ;;  %4658 = vst [vmem:[#allocation32_spill] sm:$0xff] %v2953_v58 }
 0x144   : > { %2372 = vrot.lane.b32.xlu0 %v4528_v1, %s2550_s20  ;;  %887 = vrot.lane.b32.xlu1 %v2675_v13, %s2550_s20 }
 0x146   : > { %v2959_v26 = vpop.permute.xlu0 %601  ;;  %v2961_v0 = vpop.permute.xlu1 %603 }
 0x147   : > { %4659 = vst [vmem:[#allocation33_spill] sm:$0xff] %v2959_v26  ;;  %4660 = vst [vmem:[#allocation34_spill] sm:$0xff] %v2961_v0 }
 0x148   : > { %893 = vrot.lane.b32.xlu0 %v2689_v15, %s2550_s20  ;;  %891 = vrot.lane.b32.xlu1 %v2682_v14, %s2550_s20 }
 0x14a   : > { %v2967_v57 = vpop.permute.xlu0 %605  ;;  %v2969_v56 = vpop.permute.xlu1 %607 }
 0x14b   : > { %4661 = vst [vmem:[#allocation35_spill] sm:$0xff] %v2967_v57  ;;  %4662 = vst [vmem:[#allocation36_spill] sm:$0xff] %v2969_v56 }
 0x14c   : > { %899 = vrot.lane.b32.xlu0 %v2699_v17, %s2550_s20  ;;  %897 = vrot.lane.b32.xlu1 %v2692_v16, %s2550_s20 }
 0x14e   : > { %v2975_v1 = vpop.permute.xlu0 %609  ;;  %v2977_v26 = vpop.permute.xlu1 %611 }
 0x14f   : > { %4663 = vst [vmem:[#allocation37_spill] sm:$0xff] %v2975_v1  ;;  %4664 = vst [vmem:[#allocation38_spill] sm:$0xff] %v2977_v26 }
 0x150   : > { %955 = vperm.xlu0 %2377, %v2712_v19   ;;  %951 = vperm.xlu1 %2376, %v2704_v18  }
 0x152   : > { %v2981_v0 = vpop.permute.xlu0 %613  ;;  %v2983_v58 = vpop.permute.xlu1 %615 }
 0x153   : > { %4665 = vst [vmem:[#allocation39_spill] sm:$0xff] %v2981_v0  ;;  %4666 = vst [vmem:[#allocation40_spill] sm:$0xff] %v2983_v58 }
 0x154   : > { %967 = vperm.xlu0 %2377, %v2736_v23   ;;  %959 = vperm.xlu1 %2376, %v2724_v21  }
 0x156   : > { %v2987_v57 = vpop.permute.xlu0 %617  ;;  %v2989_v55 = vpop.permute.xlu1 %619 }
 0x157   : > { %4667 = vst [vmem:[#allocation41_spill] sm:$0xff] %v2987_v57  ;;  %4668 = vst [vmem:[#allocation42_spill] sm:$0xff] %v2989_v55 }
 0x158   : > { %975 = vperm.xlu0 %2377, %v2748_v25   ;;  %963 = vperm.xlu1 %2376, %v2717_v20  }
 0x15a   : > { %v2993_v62 = vpop.permute.xlu0 %621  ;;  %v2995_v38 = vpop.permute.xlu1 %623 }
 0x15c   : > { %2378 = vset.pattern.permute.xlu0 %v2552_v63  ;;  %971 = vperm.xlu1 %2376, %v2729_v22  }
 0x15d   : > { %1015 = vperm.xlu0 %2378, %v2704_v18  }
 0x15e   : > { %v2999_v51 = vpop.permute.xlu0 %625  ;;  %v3001_v59 = vpop.permute.xlu1 %627 }
 0x160   : > { %979 = vperm.xlu1 %2376, %v2741_v24  }
 0x161   : > { %1027 = vperm.xlu0 %2378, %v2717_v20  }
 0x162   : > { %v3005_v61 = vpop.permute.xlu0 %629  ;;  %v3007_v49 = vpop.permute.xlu1 %631 }
 0x163   : > { %4669 = vst [vmem:[#allocation43_spill] sm:$0xff] %v3007_v49 }
 0x164   : > { %2379 = vset.pattern.permute.xlu1 %v2552_v63 }
 0x165   : > { %1035 = vperm.xlu0 %2378, %v2729_v22   ;;  %1019 = vperm.xlu1 %2379, %v2712_v19  }
 0x166   : > { %v3011_v48 = vpop.permute.xlu0 %633  ;;  %v3013_v60 = vpop.permute.xlu1 %635 }
 0x167   : > { %4670 = vst [vmem:[#allocation44_spill] sm:$0xff] %v3011_v48  ;;  %4671 = vst [vmem:[#allocation45_spill] sm:$0xff] %v3013_v60  ;;  %v2554_v48 = vmov 7  }
 0x169   : > { %1043 = vperm.xlu0 %2378, %v2741_v24   ;;  %1023 = vperm.xlu1 %2379, %v2724_v21  }
 0x16a   : > { %v3017_v47 = vpop.permute.xlu0 %702  ;;  %v3019_v46 = vpop.permute.xlu1 %2340 }
 0x16b   : > { %4672 = vst [vmem:[#allocation46_spill] sm:$0xff] %v3017_v47  ;;  %4673 = vst [vmem:[#allocation47_spill] sm:$0xff] %v3019_v46 }
 0x16d   : > { %1128 = vrot.lane.b32.xlu0 %v2618_v2, %s2553_s22  ;;  %1031 = vperm.xlu1 %2379, %v2736_v23  }
 0x16e   : > { %v3024_v63 = vpop.permute.xlu0 %706  ;;  %v3026_v49 = vpop.permute.xlu1 %708  ;;  %2401 = vset.pattern.permute.xlu0 %v2554_v48 }
 0x16f   : > { %4674 = vst [vmem:[#allocation48_spill] sm:$0xff] %v3024_v63  ;;  %4675 = vst [vmem:[#allocation49_spill] sm:$0xff] %v3026_v49  ;;  %v2555_v63 = vmov 5  }
 0x171   : > { %1132 = vrot.lane.b32.xlu0 %v2628_v4, %s2553_s22  ;;  %1039 = vperm.xlu1 %2379, %v2748_v25  }
 0x172   : > { %v3031_v60 = vpop.permute.xlu0 %712  ;;  %v3033_v47 = vpop.permute.xlu1 %714 }
 0x173   : > { %4676 = vst [vmem:[#allocation50_spill] sm:$0xff] %v3031_v60  ;;  %4677 = vst [vmem:[#allocation51_spill] sm:$0xff] %v3033_v47 }
 0x175   : > { %1138 = vrot.lane.b32.xlu0 %v2638_v6, %s2553_s22  ;;  %1126 = vrot.lane.b32.xlu1 %v2621_v3, %s2553_s22 }
 0x176   : > { %2400 = vset.pattern.permute.xlu1 %v2555_v63  ;;  %v3039_v49 = vpop.permute.xlu0 %2345  ;;  %v3041_v34 = vpop.permute.xlu1 %718 }
 0x177   : > { %4678 = vst [vmem:[#allocation52_spill] sm:$0xff] %v3041_v34 }
 0x179   : > { %2386 = vrot.lane.b32.xlu0 %v4679_v33, %s2553_s22  ;;  %2381 = vrot.lane.b32.xlu1 %v4679_v33, %s2553_s22 }
 0x17a   : > { %v3047_v30 = vpop.permute.xlu0 %720  ;;  %v3049_v31 = vpop.permute.xlu1 %724 }
 0x17b   : > { %4680 = vst [vmem:[#allocation53_spill] sm:$0xff] %v3047_v30 }
 0x17d   : > { %1146 = vrot.lane.b32.xlu0 %v2655_v9, %s2553_s22  ;;  %1134 = vrot.lane.b32.xlu1 %v2631_v5, %s2553_s22 }
 0x17e   : > { %v3059_v29 = vpop.permute.xlu0 %726  ;;  %v3061_v28 = vpop.permute.xlu1 %2350 }
 0x17f   : > { %4681 = vst [vmem:[#allocation54_spill] sm:$0xff] %v3061_v28 }
 0x181   : > { %1152 = vrot.lane.b32.xlu0 %v2665_v11, %s2553_s22  ;;  %1140 = vrot.lane.b32.xlu1 %v2645_v7, %s2553_s22 }
 0x182   : > { %v3067_v27 = vpop.permute.xlu0 %730  ;;  %v3069_v47 = vpop.permute.xlu1 %732 }
 0x185   : > { %1156 = vrot.lane.b32.xlu0 %v2672_v12, %s2553_s22  ;;  %1144 = vrot.lane.b32.xlu1 %v2648_v8, %s2553_s22 }
 0x186   : > { %v3079_v60 = vpop.permute.xlu0 %736  ;;  %v3081_v26 = vpop.permute.xlu1 %738 }
 0x187   : > { %4682 = vst [vmem:[#allocation55_spill] sm:$0xff] %v3079_v60  ;;  %4683 = vst [vmem:[#allocation56_spill] sm:$0xff] %v3081_v26 }
 0x189   : > { %1162 = vrot.lane.b32.xlu0 %v2682_v14, %s2553_s22  ;;  %1150 = vrot.lane.b32.xlu1 %v2662_v10, %s2553_s22 }
 0x18d   : > { %2396 = vrot.lane.b32.xlu0 %v4679_v33, %s2553_s22  ;;  %2391 = vrot.lane.b32.xlu1 %v4679_v33, %s2553_s22 }
 0x191   : > { %1170 = vrot.lane.b32.xlu0 %v2699_v17, %s2553_s22  ;;  %1158 = vrot.lane.b32.xlu1 %v2675_v13, %s2553_s22 }
 0x193   : > { %v3087_v50 = vpop.permute.xlu0 %790  ;;  %v3089_v56 = vpop.permute.xlu1 %794 }
 0x194   : > { %4684 = vst [vmem:[#allocation57_spill] sm:$0xff] %v3087_v50  ;;  %4685 = vst [vmem:[#allocation58_spill] sm:$0xff] %v3089_v56 }
 0x195   : > { %1477 = vperm.xlu0 %2401, %v2741_v24   ;;  %1164 = vrot.lane.b32.xlu1 %v2689_v15, %s2553_s22 }
 0x197   : > { %v3094_v1 = vpop.permute.xlu0 %802  ;;  %v3096_v60 = vpop.permute.xlu1 %798 }
 0x198   : > { %4686 = vst [vmem:[#allocation59_spill] sm:$0xff] %v3094_v1  ;;  %4687 = vst [vmem:[#allocation60_spill] sm:$0xff] %v3096_v60 }
 0x199   : > { %1465 = vperm.xlu0 %2401, %v2736_v23   ;;  %1168 = vrot.lane.b32.xlu1 %v2692_v16, %s2553_s22 }
 0x19b   : > { %v3101_v26 = vpop.permute.xlu0 %810  ;;  %v3103_v46 = vpop.permute.xlu1 %806 }
 0x19c   : > { %4688 = vst [vmem:[#allocation61_spill] sm:$0xff] %v3103_v46 }
 0x19d   : > { %1457 = vperm.xlu0 %2401, %v2724_v21   ;;  %1224 = vperm.xlu1 %2400, %v2704_v18  }
 0x19f   : > { %v3107_v56 = vpop.permute.xlu0 %818  ;;  %v3109_v50 = vpop.permute.xlu1 %814 }
 0x1a0   : > { %4689 = vst [vmem:[#allocation62_spill] sm:$0xff] %v3107_v56 }
 0x1a1   : > { %1449 = vperm.xlu0 %2401, %v2704_v18   ;;  %2402 = vset.pattern.permute.xlu1 %v2554_v48 }
 0x1a2   : > { %1473 = vperm.xlu1 %2402, %v2748_v25  }
 0x1a3   : > { %v3113_v60 = vpop.permute.xlu0 %855  ;;  %v3115_v1 = vpop.permute.xlu1 %2357 }
 0x1a4   : > { %4690 = vst [vmem:[#allocation63_spill] sm:$0xff] %v3113_v60  ;;  %4691 = vst [vmem:[#allocation64_spill] sm:$0xff] %v3115_v1 }
 0x1a5   : > { %2404 = vset.pattern.permute.xlu0 %v2555_v63 }
 0x1a6   : > { %1232 = vperm.xlu0 %2404, %v2724_v21   ;;  %1469 = vperm.xlu1 %2402, %v2729_v22  }
 0x1a7   : > { %v3119_v36 = vpop.permute.xlu0 %861  ;;  %v3121_v35 = vpop.permute.xlu1 %857 }
 0x1a8   : > { %4692 = vst [vmem:[#allocation65_spill] sm:$0xff] %v3119_v36  ;;  %4693 = vst [vmem:[#allocation66_spill] sm:$0xff] %v3121_v35 }
 0x1aa   : > { %1244 = vperm.xlu0 %2404, %v2729_v22   ;;  %1461 = vperm.xlu1 %2402, %v2717_v20  }
 0x1ab   : > { %v3125_v48 = vpop.permute.xlu0 %2362  ;;  %v3127_v56 = vpop.permute.xlu1 %863 }
 0x1ac   : > { %4694 = vst [vmem:[#allocation67_spill] sm:$0xff] %v3125_v48  ;;  %4695 = vst [vmem:[#allocation68_spill] sm:$0xff] %v3127_v56  ;;  %v4562_v56 = vmov 8  }
 0x1ae   : > { %1252 = vperm.xlu0 %2404, %v2741_v24   ;;  %1453 = vperm.xlu1 %2402, %v2712_v19  }
 0x1af   : > { %v3131_v60 = vpop.permute.xlu0 %869  ;;  %v3133_v1 = vpop.permute.xlu1 %867 }
 0x1b0   : > { %4696 = vst [vmem:[#allocation69_spill] sm:$0xff] %v3131_v60  ;;  %4697 = vst [vmem:[#allocation70_spill] sm:$0xff] %v3133_v1 }
 0x1b2   : > { %2403 = vset.pattern.permute.xlu1 %v2555_v63  ;;  %1329 = vrot.lane.b32.xlu0 %v2692_v16, %s2556_s23 }
 0x1b3   : > { %v3137_v35 = vpop.permute.xlu0 %875  ;;  %1228 = vperm.xlu1 %2403, %v2712_v19   ;;  %v3140_v36 = vpop.permute.xlu1 %873  ;;  %2411 = vset.pattern.permute.xlu0 %v4562_v56 }
 0x1b4   : > { %4698 = vst [vmem:[#allocation71_spill] sm:$0xff] %v3137_v35  ;;  %4699 = vst [vmem:[#allocation72_spill] sm:$0xff] %v3140_v36 }
 0x1b6   : > { %1751 = vperm.xlu0 %2411, %v2741_v24  }
 0x1b7   : > { %v3144_v48 = vpop.permute.xlu0 %879  ;;  %1236 = vperm.xlu1 %2403, %v2717_v20   ;;  %v3147_v63 = vpop.permute.xlu1 %2367 }
 0x1b8   : > { %4700 = vst [vmem:[#allocation73_spill] sm:$0xff] %v3144_v48  ;;  %4701 = vst [vmem:[#allocation74_spill] sm:$0xff] %v3147_v63 }
 0x1ba   : > { %2413 = vrot.lane.b32.xlu0 %v4679_v33, %s2556_s23 }
 0x1bb   : > { %v3151_v60 = vpop.permute.xlu0 %885  ;;  %1240 = vperm.xlu1 %2403, %v2736_v23   ;;  %v3154_v1 = vpop.permute.xlu1 %881 }
 0x1bc   : > { %4702 = vst [vmem:[#allocation75_spill] sm:$0xff] %v3151_v60  ;;  %4703 = vst [vmem:[#allocation76_spill] sm:$0xff] %v3154_v1 }
 0x1be   : > { %2418 = vrot.lane.b32.xlu0 %v4679_v33, %s2558_s25 }
 0x1bf   : > { %v3158_v56 = vpop.permute.xlu0 %2372  ;;  %1248 = vperm.xlu1 %2403, %v2748_v25   ;;  %v3161_v35 = vpop.permute.xlu1 %887 }
 0x1c0   : > { %4704 = vst [vmem:[#allocation77_spill] sm:$0xff] %v3158_v56 }
 0x1c3   : > { %v3163_v36 = vpop.permute.xlu0 %893  ;;  %2405 = vset.pattern.permute.xlu1 %v2559_v32  ;;  %v3165_v46 = vpop.permute.xlu1 %891 }
 0x1c4   : > { %1413 = vperm.xlu1 %2405, %v2741_v24  }
 0x1c7   : > { %v3168_v48 = vpop.permute.xlu0 %899  ;;  %v3170_v1 = vpop.permute.xlu1 %897 }
 0x1c8   : > { %4705 = vst [vmem:[#allocation78_spill] sm:$0xff] %v3168_v48  ;;  %4706 = vst [vmem:[#allocation79_spill] sm:$0xff] %v3170_v1  ;;  %1331 = vrot.lane.b32.xlu1 %v2699_v17, %s2556_s23 }
 0x1cb   : > { %v3174_v57 = vpop.permute.xlu0 %955  ;;  %v3176_v0 = vpop.permute.xlu1 %951 }
 0x1cc   : > { %4707 = vst [vmem:[#allocation80_spill] sm:$0xff] %v3174_v57  ;;  %4708 = vst [vmem:[#allocation81_spill] sm:$0xff] %v3176_v0  ;;  %2407 = vrot.lane.b32.xlu1 %v4679_v33, %s2556_s23 }
 0x1cf   : > { %v3180_v58 = vpop.permute.xlu0 %967  ;;  %v3182_v30 = vpop.permute.xlu1 %959 }
 0x1d0   : > { %4709 = vst [vmem:[#allocation82_spill] sm:$0xff] %v3180_v58  ;;  %4710 = vst [vmem:[#allocation83_spill] sm:$0xff] %v3182_v30  ;;  %1405 = vperm.xlu1 %2405, %v2729_v22  }
 0x1d3   : > { %v3185_v24 = vpop.permute.xlu0 %975  ;;  %v3187_v48 = vpop.permute.xlu1 %963 }
 0x1d4   : > { %4711 = vst [vmem:[#allocation84_spill] sm:$0xff] %v3187_v48  ;;  %1325 = vrot.lane.b32.xlu1 %v2689_v15, %s2556_s23 }
 0x1d7   : > { %v3191_v1 = vpop.permute.xlu1 %971 }
 0x1d8   : > { %4712 = vst [vmem:[#allocation85_spill] sm:$0xff] %v3191_v1  ;;  %v3193_v57 = vpop.permute.xlu0 %1015  ;;  %1323 = vrot.lane.b32.xlu1 %v2682_v14, %s2556_s23 }
 0x1d9   : > { %4713 = vst [vmem:[#allocation86_spill] sm:$0xff] %v3193_v57 }
 0x1db   : > { %v3197_v0 = vpop.permute.xlu1 %979 }
 0x1dc   : > { %4714 = vst [vmem:[#allocation87_spill] sm:$0xff] %v3197_v0  ;;  %v3199_v58 = vpop.permute.xlu0 %1027  ;;  %1319 = vrot.lane.b32.xlu1 %v2675_v13, %s2556_s23 }
 0x1dd   : > { %4715 = vst [vmem:[#allocation88_spill] sm:$0xff] %v3199_v58 }
 0x1e0   : > { %v3203_v30 = vpop.permute.xlu0 %1035  ;;  %v3205_v48 = vpop.permute.xlu1 %1019  ;;  %1669 = vrot.lane.b32.xlu1 %v2699_v17, %s2558_s25 }
 0x1e1   : > { %4716 = vst [vmem:[#allocation89_spill] sm:$0xff] %v3203_v30  ;;  %4717 = vst [vmem:[#allocation90_spill] sm:$0xff] %v3205_v48 }
 0x1e4   : > { %v3209_v34 = vpop.permute.xlu0 %1043  ;;  %v3211_v57 = vpop.permute.xlu1 %1023  ;;  %1317 = vrot.lane.b32.xlu1 %v2672_v12, %s2556_s23 }
 0x1e5   : > { %4718 = vst [vmem:[#allocation91_spill] sm:$0xff] %v3209_v34  ;;  %4719 = vst [vmem:[#allocation92_spill] sm:$0xff] %v3211_v57 }
 0x1e8   : > { %v3215_v0 = vpop.permute.xlu0 %1128  ;;  %v3217_v58 = vpop.permute.xlu1 %1031 }
 0x1e9   : > { %4720 = vst [vmem:[#allocation93_spill] sm:$0xff] %v3215_v0  ;;  %4721 = vst [vmem:[#allocation94_spill] sm:$0xff] %v3217_v58 }
 0x1ec   : > { %v3219_v52 = vpop.permute.xlu0 %1132  ;;  %v3221_v55 = vpop.permute.xlu1 %1039 }
 0x1ed   : > { %4722 = vst [vmem:[#allocation95_spill] sm:$0xff] %v3219_v52 }
 0x1f0   : > { %v3223_v30 = vpop.permute.xlu0 %1138  ;;  %v3225_v48 = vpop.permute.xlu1 %1126 }
 0x1f1   : > { %4723 = vst [vmem:[#allocation96_spill] sm:$0xff] %v3223_v30  ;;  %4724 = vst [vmem:[#allocation97_spill] sm:$0xff] %v3225_v48 }
 0x1f4   : > { %v3227_v40 = vpop.permute.xlu0 %2386  ;;  %v3229_v34 = vpop.permute.xlu1 %2381 }
 0x1f5   : > { %4725 = vst [vmem:[#allocation98_spill] sm:$0xff] %v3227_v40  ;;  %4726 = vst [vmem:[#allocation99_spill] sm:$0xff] %v3229_v34 }
 0x1f8   : > { %v3231_v57 = vpop.permute.xlu0 %1146  ;;  %v3233_v1 = vpop.permute.xlu1 %1134 }
 0x1f9   : > { %4727 = vst [vmem:[#allocation100_spill] sm:$0xff] %v3231_v57  ;;  %4728 = vst [vmem:[#allocation101_spill] sm:$0xff] %v3233_v1 }
 0x1fc   : > { %v3235_v63 = vpop.permute.xlu0 %1152  ;;  %v3237_v0 = vpop.permute.xlu1 %1140 }
 0x1fd   : > { %4729 = vst [vmem:[#allocation102_spill] sm:$0xff] %v3235_v63  ;;  %4730 = vst [vmem:[#allocation103_spill] sm:$0xff] %v3237_v0 }
 0x200   : > { %v3239_v58 = vpop.permute.xlu0 %1156  ;;  %v3241_v52 = vpop.permute.xlu1 %1144 }
 0x201   : > { %4731 = vst [vmem:[#allocation104_spill] sm:$0xff] %v3239_v58  ;;  %4732 = vst [vmem:[#allocation105_spill] sm:$0xff] %v3241_v52 }
 0x204   : > { %v3243_v60 = vpop.permute.xlu0 %1162  ;;  %v3245_v30 = vpop.permute.xlu1 %1150 }
 0x208   : > { %v3247_v48 = vpop.permute.xlu0 %2396  ;;  %v3249_v40 = vpop.permute.xlu1 %2391 }
 0x209   : > { %4733 = vst [vmem:[#allocation106_spill] sm:$0xff] %v3247_v48 }
 0x20c   : > { %v3251_v34 = vpop.permute.xlu0 %1170  ;;  %v3253_v57 = vpop.permute.xlu1 %1158 }
 0x20d   : > { %4734 = vst [vmem:[#allocation107_spill] sm:$0xff] %v3251_v34 }
 0x210   : > { %v1478_v1 = vpop.permute.xlu0 %1477  ;;  %v3255_v63 = vpop.permute.xlu1 %1164 }
 0x211   : > { %v1502_v0 = vmul.f32 %v1478_v1, %v2699_v17  ;;  %v1503_v58 = vmul.f32 0.0, %v1478_v1 }
 0x213   : > { %1574 = vrot.lane.b32.xlu0 %v1503_v58, %s2560_s26  ;;  %1572 = vrot.lane.b32.xlu1 %v1502_v0, %s2560_s26 }
 0x214   : > { %v3260_v52 = vpop.permute.xlu1 %1168 }
 0x215   : > { %4735 = vst [vmem:[#allocation108_spill] sm:$0xff] %v3260_v52 }
 0x217   : > { %1743 = vperm.xlu0 %2411, %v2729_v22   ;;  %1667 = vrot.lane.b32.xlu1 %v2692_v16, %s2558_s25  ;;  %v1501_v22 = vmul.f32 %v1478_v1, %v2692_v16 }
 0x218   : > { %v3267_v34 = vpop.permute.xlu1 %1224 }
 0x219   : > { %4736 = vst [vmem:[#allocation109_spill] sm:$0xff] %v3267_v34 }
 0x21b   : > { %2422 = vset.pattern.permute.xlu0 %v2559_v32  ;;  %1313 = vrot.lane.b32.xlu1 %v2665_v11, %s2556_s23  ;;  %v4737_v32 = vmov 8  }
 0x21c   : > { %1409 = vperm.xlu0 %2422, %v2748_v25  }
 0x21d   : > { %v1474_v17 = vpop.permute.xlu1 %1473 }
 0x21e   : > { %v1500_v0 = vmul.f32 0.0, %v1474_v17  ;;  %v1499_v34 = vmul.f32 %v1474_v17, %v2689_v15  ;;  %v1498_v1 = vmul.f32 %v1474_v17, %v2682_v14 }
 0x21f   : > { %1663 = vrot.lane.b32.xlu1 %v2689_v15, %s2558_s25 }
 0x220   : > { %1401 = vperm.xlu0 %2422, %v2736_v23  }
 0x221   : > { %v1470_v58 = vpop.permute.xlu1 %1469 }
 0x222   : > { %v1496_v15 = vmul.f32 %v1470_v58, %v2675_v13 }
 0x223   : > { %1393 = vperm.xlu1 %2405, %v2724_v21  }
 0x224   : > { %1397 = vperm.xlu0 %2422, %v2717_v20  }
 0x225   : > { %v3286_v52 = vpop.permute.xlu1 %1461 }
 0x227   : > { %1568 = vrot.lane.b32.xlu1 %v1500_v0, %s2560_s26  ;;  %v1497_v0 = vmul.f32 0.0, %v1470_v58 }
 0x228   : > { %1570 = vrot.lane.b32.xlu0 %v1501_v22, %s2560_s26  ;;  %2443 = vset.pattern.permute.xlu1 %v4737_v32  ;;  %v1466_v22 = vpop.permute.xlu0 %1465  ;;  %v4596_v32 = vmov 9  }
 0x229   : > { %v3294_v16 = vpop.permute.xlu1 %1453 }
 0x22a   : > { %4738 = vst [vmem:[#allocation110_spill] sm:$0xff] %v3294_v16 }
 0x22b   : > { %1307 = vrot.lane.b32.xlu1 %v2655_v9, %s2556_s23 }
 0x22c   : > { %1311 = vrot.lane.b32.xlu0 %v2662_v10, %s2556_s23 }
 0x22f   : > { %2424 = vrot.lane.b32.xlu1 %v4679_v33, %s2556_s23 }
 0x230   : > { %1566 = vrot.lane.b32.xlu0 %v1499_v34, %s2560_s26  ;;  %v3301_v34 = vpop.permute.xlu1 %1228 }
 0x231   : > { %4739 = vst [vmem:[#allocation111_spill] sm:$0xff] %v3301_v34 }
 0x233   : > { %1657 = vrot.lane.b32.xlu1 %v2675_v13, %s2558_s25  ;;  %v1495_v13 = vmul.f32 %v1470_v58, %v2672_v12  ;;  %v1492_v58 = vmul.f32 %v1466_v22, %v2662_v10 }
 0x234   : > { %1661 = vrot.lane.b32.xlu0 %v2682_v14, %s2558_s25  ;;  %v3307_v14 = vpop.permute.xlu1 %1236 }
 0x235   : > { %4740 = vst [vmem:[#allocation112_spill] sm:$0xff] %v3307_v14 }
 0x237   : > { %1305 = vrot.lane.b32.xlu1 %v2648_v8, %s2556_s23 }
 0x238   : > { %1564 = vrot.lane.b32.xlu0 %v1498_v1, %s2560_s26  ;;  %v3315_v17 = vpop.permute.xlu1 %1240 }
 0x23b   : > { %1560 = vrot.lane.b32.xlu1 %v1496_v15, %s2560_s26 }
 0x23c   : > { %2429 = vrot.lane.b32.xlu0 %v4679_v33, %s2558_s25 }
 0x23f   : > { %1562 = vrot.lane.b32.xlu1 %v1497_v0, %s2560_s26 }
 0x240   : > { %1389 = vperm.xlu0 %2422, %v2712_v19   ;;  %v3323_v19 = vpop.permute.xlu1 %1248 }
 0x243   : > { %1301 = vrot.lane.b32.xlu1 %v2645_v7, %s2556_s23  ;;  %v1493_v7 = vmul.f32 %v1466_v22, %v2665_v11 }
 0x244   : > { %1655 = vrot.lane.b32.xlu0 %v2672_v12, %s2558_s25  ;;  %v1494_v12 = vmul.f32 0.0, %v1466_v22 }
 0x247   : > { %1558 = vrot.lane.b32.xlu1 %v1495_v13, %s2560_s26 }
 0x248   : > { %1651 = vrot.lane.b32.xlu0 %v2665_v11, %s2558_s25 }
 0x24b   : > { %1299 = vrot.lane.b32.xlu1 %v2638_v6, %s2556_s23  ;;  %v3331_v6 = vpop.permute.xlu1 %1413 }
 0x24c   : > { %1385 = vperm.xlu0 %2422, %v2704_v18   ;;  %4741 = vst [vmem:[#allocation113_spill] sm:$0xff] %v3331_v6 }
 0x24f   : > { %1554 = vrot.lane.b32.xlu1 %v1493_v7, %s2560_s26  ;;  %v3338_v11 = vpop.permute.xlu1 %1331 }
 0x250   : > { %1649 = vrot.lane.b32.xlu0 %v2662_v10, %s2558_s25  ;;  %4742 = vst [vmem:[#allocation114_spill] sm:$0xff] %v3338_v11  ;;  %v3344_v10 = vpop.permute.xlu0 %1457 }
 0x251   : > { %2444 = vset.pattern.permute.xlu0 %v4596_v32 }
 0x253   : > { %1556 = vrot.lane.b32.xlu1 %v1494_v12, %s2560_s26  ;;  %v3346_v18 = vpop.permute.xlu1 %2407  ;;  %v1962_v12 = vadd.f32 %v2631_v5, %v2628_v4 }
 0x254   : > { %1552 = vrot.lane.b32.xlu0 %v1492_v58, %s2560_s26  ;;  %4743 = vst [vmem:[#allocation115_spill] sm:$0xff] %v3346_v18  ;;  %v3348_v1 = vpop.permute.xlu0 %1449 }
 0x255   : > { %4744 = vst [vmem:[#allocation116_spill] sm:$0xff] %v3348_v1  ;;  %v2323_v1 = vunpack.i.l.bf16 %v2789_v37 }
 0x257   : > { %1295 = vrot.lane.b32.xlu1 %v2631_v5, %s2556_s23  ;;  %v3350_v15 = vpop.permute.xlu1 %1405 }
 0x258   : > { %2439 = vrot.lane.b32.xlu0 %v4679_v33, %s2558_s25  ;;  %v3352_v0 = vpop.permute.xlu0 %1232 }
 0x259   : > { %4745 = vst [vmem:[#allocation117_spill] sm:$0xff] %v3352_v0  ;;  %v1959_v0 = vadd.f32 %v2618_v2, %v2621_v3 }
 0x25b   : > { %2434 = vrot.lane.b32.xlu1 %v4679_v33, %s2556_s23  ;;  %v3354_v13 = vpop.permute.xlu1 %1325 }
 0x25c   : > { %v3356_v22 = vpop.permute.xlu0 %1244 }
 0x25f   : > { %1645 = vrot.lane.b32.xlu1 %v2655_v9, %s2558_s25  ;;  %v3358_v7 = vpop.permute.xlu1 %1323 }
 0x260   : > { %v3362_v9 = vpop.permute.xlu0 %1252 }
 0x261   : > { %4746 = vst [vmem:[#allocation118_spill] sm:$0xff] %v3362_v9  ;;  %v4606_v9 = vlaneseq }
 0x263   : > { %v3364_v58 = vpop.permute.xlu1 %1319  ;;  %v274_v2 = vand.u32 127, %v4606_v9  ;;  %v2324_v9 = vunpack.i.h.bf16 %v2789_v37 }
 0x264   : > { %v3366_v32 = vpop.permute.xlu0 %1329 }
 0x265   : > { %4747 = vst [vmem:[#allocation119_spill] sm:$0xff] %v3366_v32 }
 0x267   : > { %v3368_v34 = vpop.permute.xlu1 %1669 }
 0x268   : > { %4748 = vst [vmem:[#allocation120_spill] sm:$0xff] %v3368_v34  ;;  %v3372_v6 = vpop.permute.xlu0 %1751 }
 0x269   : > { %4749 = vst [vmem:[#allocation121_spill] sm:$0xff] %v3372_v6  ;;  %v1489_v6 = vmul.f32 %v3286_v52, %v2648_v8 }
 0x26b   : > { %v3374_v11 = vpop.permute.xlu1 %1317 }
 0x26c   : > { %v3376_v14 = vpop.permute.xlu0 %2413 }
 0x277   : > { %1963 = vadd.xlane.f32.xlu0 %v1962_v12  ;;  %v3380_v12 = vpop.permute.xlu0 %2418 }
 0x278   : > { %4751 = vst [vmem:[#allocation123_spill] sm:$0xff] %v3380_v12  ;;  %v2328_v12 = vunpack.i.l.bf16 %v2801_v43  ;;  %v3432_v43 = vsel %vm380_vm0, %v2324_v9, %v2797_v41  ;;  %v651_v9 = vsel %vm637_vm6, %v3001_v59, %v3005_v61 }
 0x283   : > { %1960 = vadd.xlane.f32.xlu1 %v1959_v0  ;;  %v275_v0 = vadd.s32 128, %v274_v2 }
 0x285   : > { %v3378_v5 = vpop.permute.xlu1 %1572  ;;  %v3384_v32 = vpop.permute.xlu0 %1574 }
 0x286   : > { %4750 = vst [vmem:[#allocation122_spill] sm:$0xff] %v3378_v5  ;;  %4752 = vst [vmem:[#allocation124_spill] sm:$0xff] %v3384_v32  ;;  %v276_v32 = vand.u32 15, %v274_v2  ;;  %v394_v2 = vsel %vm380_vm0, %v2803_v44, %v2805_v45 }
 0x288   : > { %vm3417_vm3 = vcmp.ge.s32.totalorder %v276_v32, 1  ;;  %vm3464_vm7 = vcmp.lt.s32.totalorder %v276_v32, 15 }
 0x289   : > { %v3386_v34 = vpop.permute.xlu1 %1667 }
 0x28a   : > { %4753 = vst [vmem:[#allocation125_spill] sm:$0xff] %v3386_v34 }
 0x28d   : > { %1293 = vrot.lane.b32.xlu0 %v2628_v4, %s2556_s23  ;;  %v3395_v5 = vpop.permute.xlu1 %1313  ;;  %v277_v4 = vand.u32 15, %v275_v0  ;;  %v3428_v0 = vsel %vm380_vm0, %v2323_v1, %v2793_v39  ;;  %v915_v1 = vsel %vm901_vm4, %v3165_v46, %v3163_v36  ;;  %v2398_v36 = vunpack.i.l.bf16 %v3247_v48 }
 0x28f   : > { %vm3410_vm2 = vcmp.ge.s32.totalorder %v277_v4, 1  ;;  %vm3439_vm5 = vcmp.lt.s32.totalorder %v277_v4, 15  ;;  %v1188_v48 = vsel %vm1174_vm8, %v3255_v63, %v2398_v36 }
 0x291   : > { %1643 = vrot.lane.b32.xlu0 %v2648_v8, %s2558_s25  ;;  %v392_v8 = vsel %vm380_vm0, %v2797_v41, %v2799_v42  ;;  %v426_v41 = vsel %vm3410_vm2, %v394_v2, 0.0  ;;  %v2410_v2 = vunpack.i.h.bf16 %v3346_v18  ;;  %v3479_v18 = vld [vmem:[%s2615_s24 + $0x38] sm:$0xff] }
 0x292   : > { %v3391_v3 = vpop.permute.xlu0 %1743  ;;  %v424_v45 = vsel %vm3410_vm2, %v392_v8, 0.0  ;;  %v490_v4 = vmul.f32 %v2823_v54, %v426_v41 }
 0x293   : > { %v488_v41 = vmul.f32 %v2821_v53, %v424_v45  ;;  %v2374_v45 = vunpack.i.l.bf16 %v3158_v56 }
 0x294   : > { %1747 = vperm.xlu1 %2443, %v2748_v25   ;;  %v3408_v25 = vpop.permute.xlu1 %1663 }
 0x295   : > { %1546 = vrot.lane.b32.xlu0 %v1489_v6, %s2560_s26  ;;  %4754 = vst [vmem:[#allocation126_spill] sm:$0xff] %v3408_v25  ;;  %v393_v25 = vsel %vm380_vm0, %v2328_v12, %v2803_v44 }
 0x296   : > { %v425_v61 = vsel %vm3417_vm3, %v393_v25, 0.0 }
 0x297   : > { %v3399_v34 = vpop.permute.xlu0 %1409  ;;  %v489_v32 = vmul.f32 %v2823_v54, %v425_v61  ;;  %v1349_v54 = vsel %vm1335_vm9, %v3354_v13, %v2410_v2  ;;  %v1220_v61 = vsel %vm3439_vm5, %v1188_v48, 0.0 }
 0x298   : > { %1739 = vperm.xlu1 %2443, %v2736_v23   ;;  %v754_v23 = vsel %vm740_vm1, %v3067_v27, %v3069_v47  ;;  %v1381_v48 = vsel %vm3410_vm2, %v1349_v54, 0.0 }
 0x299   : > { %v786_v44 = vsel %vm3439_vm5, %v754_v23, 0.0  ;;  %v947_v23 = vsel %vm3410_vm2, %v915_v1, 0.0  ;;  %v1490_v1 = vmul.f32 %v3479_v18, %v3286_v52 }
 0x29a   : > { %v834_v8 = vmul.f32 %v3109_v50, %v786_v44  ;;  %v683_v44 = vadd.f32 %v651_v9, %v490_v4  ;;  %v3485_v9 = vld [vmem:[%s2615_s24 + $0x68] sm:$0xff] }
 0x29b   : > { %v3424_v42 = vpop.permute.xlu0 %1401  ;;  %v1059_v4 = vmul.f32 %v3485_v9, %v3221_v55 }
 0x29c   : > { %1735 = vperm.xlu1 %2443, %v2717_v20   ;;  %v2352_v20 = vunpack.i.l.bf16 %v3061_v28  ;;  %v850_v33 = vadd.f32 %v834_v8, %v683_v44  ;;  %v752_v8 = vsel %vm740_vm1, %v3049_v31, %v3059_v29  ;;  %v1268_v44 = vmul.f32 %v3323_v19, %v1220_v61 }
 0x29d   : > { %v1491_v29 = vmul.f32 0.0, %v3286_v52 }
 0x29e   : > { %v3454_v12 = vpop.permute.xlu1 %1393  ;;  %v753_v25 = vsel %vm740_vm1, %v2352_v20, %v3067_v27  ;;  %v649_v27 = vsel %vm637_vm6, %v2993_v62, %v2995_v38  ;;  %v650_v20 = vsel %vm637_vm6, %v2999_v51, %v3001_v59  ;;  %v2348_v51 = vunpack.i.h.bf16 %v3039_v49 }
 0x29f   : > { %4761 = vst [vmem:[#allocation127_spill] sm:$0xff] %v3454_v12  ;;  %v3460_v16 = vpop.permute.xlu0 %1397  ;;  %v995_v12 = vmul.f32 %v3185_v24, %v947_v23  ;;  %v785_v2 = vsel %vm3464_vm7, %v753_v25, 0.0  ;;  %v914_v23 = vsel %vm901_vm4, %v2374_v45, %v3165_v46  ;;  %v682_v25 = vadd.f32 %v650_v20, %v489_v32  ;;  %v3537_v20 = vld [vmem:[%s2615_s24 + $0x60] sm:$0xff] }
 0x2a0   : > { %1731 = vperm.xlu1 %2443, %v2724_v21   ;;  %v833_v59 = vmul.f32 %v3109_v50, %v785_v2  ;;  %v1429_v46 = vmul.f32 %v3399_v34, %v1381_v48  ;;  %v784_v50 = vsel %vm3439_vm5, %v752_v8, 0.0  ;;  %v946_v52 = vsel %vm3417_vm3, %v914_v23, 0.0  ;;  %4765 = vst [vmem:[#allocation129_spill] sm:$0xff] %v3537_v20  ;;  %v4766_v23 = vld [vmem:[#allocation75_spill] sm:$0xff]  ;;  %v4767_v48 = vld [vmem:[#allocation74_spill] sm:$0xff] }
 0x2a1   : > { %v1011_v38 = vadd.f32 %v995_v12, %v850_v33  ;;  %v3520_v12 = vsel %vm740_vm1, %v2348_v51, %v3049_v31  ;;  %v1187_v32 = vsel %vm1174_vm8, %v3243_v60, %v3255_v63  ;;  %v832_v54 = vmul.f32 %v3101_v26, %v784_v50 }
 0x2a2   : > { %v1569_v21 = vpop.permute.xlu1 %1568  ;;  %v1058_v8 = vmul.f32 %v3537_v20, %v3221_v55  ;;  %v1348_v60 = vsel %vm1335_vm9, %v3358_v7, %v3354_v13  ;;  %v1219_v55 = vsel %vm3464_vm7, %v1187_v32, 0.0  ;;  %v3560_v13 = vld [vmem:[%s4518_s1 + $0x8] sm:$0xff] }
 0x2a3   : > { %v3491_v36 = vpop.permute.xlu0 %1570  ;;  %v1075_v56 = vadd.f32 %v1059_v4, %v1011_v38  ;;  %v913_v38 = vsel %vm901_vm4, %v4766_v23, %v3161_v35 }
 0x2a4   : > { %4764 = vst [vmem:[#allocation128_spill] sm:$0xff] %v3491_v36  ;;  %1548 = vrot.lane.b32.xlu1 %v1490_v1, %s2560_s26  ;;  %v681_v1 = vadd.f32 %v649_v27, %v488_v41  ;;  %v994_v41 = vmul.f32 %v3185_v24, %v946_v52  ;;  %v849_v27 = vadd.f32 %v833_v59, %v682_v25  ;;  %v2370_v25 = vunpack.i.h.bf16 %v4767_v48 }
 0x2a5   : > { %v1284_v4 = vadd.f32 %v1268_v44, %v1075_v56  ;;  %v2415_v44 = vunpack.i.l.bf16 %v3376_v14  ;;  %v1267_v59 = vmul.f32 %v3323_v19, %v1219_v55  ;;  %v945_v19 = vsel %vm3410_vm2, %v913_v38, 0.0  ;;  %v4769_v38 = vld [vmem:[#allocation13_spill] sm:$0xff] }
 0x2a6   : > { %v3515_v36 = vpop.permute.xlu1 %1307  ;;  %v1010_v7 = vadd.f32 %v994_v41, %v849_v27  ;;  %v3605_v55 = vsel %vm380_vm0, %v2793_v39, %v4769_v38  ;;  %v4771_v39 = vld [vmem:[#allocation89_spill] sm:$0xff] }
 0x2a7   : > { %v1312_v33 = vpop.permute.xlu0 %1311  ;;  %v1445_v56 = vadd.f32 %v1429_v46, %v1284_v4  ;;  %v1380_v46 = vsel %vm3417_vm3, %v1348_v60, 0.0  ;;  %v4768_v4 = vld [vmem:[#allocation85_spill] sm:$0xff]  ;;  %v1347_v60 = vsel %vm1335_vm9, %v3364_v58, %v2415_v44  ;;  %v423_v44 = vsel %vm3417_vm3, %v3432_v43, 0.0 }
 0x2a8   : > { %v1344_v45 = vsel %vm1335_vm9, %v1312_v33, %v3395_v5  ;;  %1550 = vrot.lane.b32.xlu1 %v1491_v29, %s2560_s26  ;;  %v1074_v52 = vadd.f32 %v1058_v8, %v1010_v7  ;;  %v3598_v8 = vld [vmem:[%s2615_s24 + $0x28] sm:$0xff] }
 0x2a9   : > { %v1376_v31 = vsel %vm3417_vm3, %v1344_v45, 0.0  ;;  %v1428_v45 = vmul.f32 %v3399_v34, %v1380_v46  ;;  %v3595_v34 = vld [vmem:[%s2615_s24 + $0x20] sm:$0xff]  ;;  %v848_v46 = vadd.f32 %v832_v54, %v681_v1 }
 0x2aa   : > { %v3542_v61 = vmul.f32 %v3424_v42, %v1376_v31  ;;  %v3544_v24 = vpop.permute.xlu1 %2424  ;;  %v993_v31 = vmul.f32 %v4768_v4, %v945_v19  ;;  %v3619_v19 = vld [vmem:[%s2615_s24 + $0x58] sm:$0xff] }
 0x2ab   : > { %v2426_v63 = vunpack.i.l.bf16 %v3544_v24  ;;  %v1567_v2 = vpop.permute.xlu0 %1566  ;;  %v1057_v38 = vmul.f32 %v3619_v19, %v4771_v39 }
 0x2ac   : > { %v1590_v51 = vsel %vm1576_vm10, %v1567_v2, %v1569_v21  ;;  %1727 = vperm.xlu1 %2443, %v3560_v13   ;;  %v2394_v21 = vunpack.i.h.bf16 %v3249_v40  ;;  %v1009_v54 = vadd.f32 %v993_v31, %v848_v46 }
 0x2ad   : > { %v1343_v35 = vsel %vm1335_vm9, %v3515_v36, %v2426_v63  ;;  %v3566_v29 = vadd.f32 %v1590_v51, %v1445_v56  ;;  %v3590_v56 = vld [vmem:[%s2615_s24 + $0x8] sm:$0xff]  ;;  %v1965_v63 = vadd.f32 %v3598_v8, %v3595_v34  ;;  %v4770_v51 = vld [vmem:[#allocation42_spill] sm:$0xff] }
 0x2ae   : > { %v1375_v33 = vsel %vm3410_vm2, %v1343_v35, 0.0  ;;  %v3574_v50 = vpop.permute.xlu1 %1657  ;;  %v1186_v27 = vsel %vm1174_vm8, %v3253_v57, %v2394_v21  ;;  %v648_v7 = vsel %vm637_vm6, %v4770_v51, %v2993_v62  ;;  %v1283_v35 = vadd.f32 %v1267_v59, %v1074_v52 }
 0x2af   : > { %v3579_v41 = vpop.permute.xlu0 %1661  ;;  %v3582_v32 = vmul.f32 %v3460_v16, %v1375_v33  ;;  %v783_v21 = vsel %vm3464_vm7, %v3520_v12, 0.0  ;;  %v912_v33 = vsel %vm901_vm4, %v2370_v25, %v4766_v23  ;;  %v1218_v43 = vsel %vm3439_vm5, %v1186_v27, 0.0 }
 0x2b0   : > { %1289 = vrot.lane.b32.xlu1 %v3590_v56, %s2556_s23  ;;  %v1379_v62 = vsel %vm3410_vm2, %v1347_v60, 0.0  ;;  %v1444_v59 = vadd.f32 %v1428_v45, %v1283_v35  ;;  %v1266_v23 = vmul.f32 %v3356_v22, %v1218_v43  ;;  %v487_v27 = vmul.f32 %v2821_v53, %v423_v44  ;;  %v4772_v35 = vld [vmem:[#allocation104_spill] sm:$0xff] }
 0x2b1   : > { %v831_v45 = vmul.f32 %v3101_v26, %v783_v21  ;;  %v944_v31 = vsel %vm3417_vm3, %v912_v33, 0.0  ;;  %v1073_v60 = vadd.f32 %v1057_v38, %v1009_v54  ;;  %v422_v53 = vsel %vm3410_vm2, %v3605_v55, 0.0  ;;  %v3664_v38 = vld [vmem:[%s2615_s24] sm:$0xff] }
 0x2b2   : > { %v1306_v20 = vpop.permute.xlu1 %1305  ;;  %v421_v26 = vsel %vm3417_vm3, %v3428_v0, 0.0  ;;  %v992_v44 = vmul.f32 %v4768_v4, %v944_v31  ;;  %v1185_v21 = vsel %vm1174_vm8, %v4772_v35, %v3253_v57  ;;  %v1346_v33 = vsel %vm1335_vm9, %v3374_v11, %v3364_v58  ;;  %v4773_v0 = vld [vmem:[#allocation21_spill] sm:$0xff]  ;;  %v4774_v31 = vld [vmem:[#allocation52_spill] sm:$0xff] }
 0x2b3   : > { %v1342_v12 = vsel %vm1335_vm9, %v1306_v20, %v3515_v36  ;;  %v1565_v1 = vpop.permute.xlu0 %1564  ;;  %v1282_v46 = vadd.f32 %v1266_v23, %v1073_v60  ;;  %v485_v4 = vmul.f32 %v4773_v0, %v421_v26  ;;  %v1487_v11 = vmul.f32 %v3598_v8, %v3344_v10 }
 0x2b4   : > { %v1374_v25 = vsel %vm3417_vm3, %v1342_v12, 0.0  ;;  %v1589_v52 = vsel %vm1576_vm10, %v1565_v1, %v1567_v2  ;;  %1966 = vadd.xlane.f32.xlu0 %v1965_v63  ;;  %1639 = vrot.lane.b32.xlu1 %v3598_v8, %s2558_s25  ;;  %v1427_v2 = vmul.f32 %v3350_v15, %v1379_v62  ;;  %v3671_v62 = vld [vmem:[%s2615_s24 + $0x50] sm:$0xff]  ;;  %v1217_v1 = vsel %vm3464_vm7, %v1185_v21, 0.0 }
 0x2b5   : > { %v3638_v36 = vmul.f32 %v3460_v16, %v1374_v25  ;;  %v3640_v20 = vadd.f32 %v1589_v52, %v1444_v59  ;;  %v680_v16 = vadd.f32 %v648_v7, %v487_v27  ;;  %v2347_v7 = vunpack.i.l.bf16 %v3039_v49 }
 0x2b6   : > { %v3645_v63 = vpop.permute.xlu1 %1560  ;;  %v1056_v57 = vmul.f32 %v3671_v62, %v4771_v39  ;;  %v1443_v12 = vadd.f32 %v1427_v2, %v1282_v46  ;;  %v1378_v49 = vsel %vm3417_vm3, %v1346_v33, 0.0  ;;  %v1265_v52 = vmul.f32 %v3356_v22, %v1217_v1  ;;  %v4775_v2 = vld [vmem:[#allocation53_spill] sm:$0xff] }
 0x2b7   : > { %v3654_v51 = vpop.permute.xlu0 %2429  ;;  %v847_v43 = vadd.f32 %v831_v45, %v680_v16  ;;  %v749_v60 = vsel %vm740_vm1, %v2347_v7, %v4774_v31  ;;  %v750_v26 = vsel %vm740_vm1, %v4774_v31, %v4775_v2  ;;  %v2369_v16 = vunpack.i.l.bf16 %v4767_v48  ;;  %v4778_v7 = vld [vmem:[#allocation39_spill] sm:$0xff] }
 0x2b8   : > { %v2431_v55 = vunpack.i.l.bf16 %v3654_v51  ;;  %1287 = vrot.lane.b32.xlu1 %v3664_v38, %s2556_s23  ;;  %v2427_v35 = vunpack.i.h.bf16 %v3544_v24  ;;  %v1426_v22 = vmul.f32 %v3350_v15, %v1378_v49  ;;  %v2393_v1 = vunpack.i.l.bf16 %v3249_v40 }
 0x2b9   : > { %v1008_v25 = vadd.f32 %v992_v44, %v847_v43  ;;  %v1488_v44 = vmul.f32 0.0, %v3344_v10  ;;  %v4777_v43 = vld [vmem:[#allocation40_spill] sm:$0xff] }
 0x2ba   : > { %v1685_v58 = vsel %vm1673_vm11, %v3574_v50, %v2431_v55  ;;  %v1563_v59 = vpop.permute.xlu1 %1562  ;;  %v486_v55 = vmul.f32 %v4773_v0, %v422_v53  ;;  %v782_v0 = vsel %vm3439_vm5, %v750_v26, 0.0 }
 0x2bb   : > { %v1588_v54 = vsel %vm1576_vm10, %v3645_v63, %v1563_v59  ;;  %v3685_v23 = vpop.permute.xlu0 %1389  ;;  %v1717_v39 = vsel %vm3439_vm5, %v1685_v58, 0.0  ;;  %v1072_v21 = vadd.f32 %v1056_v57, %v1008_v25  ;;  %v4779_v58 = vld [vmem:[#allocation41_spill] sm:$0xff]  ;;  %v4780_v59 = vld [vmem:[#allocation76_spill] sm:$0xff] }
 0x2bc   : > { %v1620_v27 = vadd.f32 %v1588_v54, %v1443_v12  ;;  %1542 = vrot.lane.b32.xlu1 %v1487_v11, %s2560_s26  ;;  %v1765_v45 = vmul.f32 %v3391_v3, %v1717_v39  ;;  %v646_v11 = vsel %vm637_vm6, %v4778_v7, %v4777_v43  ;;  %v647_v48 = vsel %vm637_vm6, %v4777_v43, %v4779_v58  ;;  %v4781_v12 = vld [vmem:[#allocation73_spill] sm:$0xff] }
 0x2bd   : > { %v911_v15 = vsel %vm901_vm4, %v4781_v12, %v4780_v59  ;;  %v1281_v49 = vadd.f32 %v1265_v52, %v1072_v21  ;;  %v781_v54 = vsel %vm3464_vm7, %v749_v60, 0.0  ;;  %v910_v39 = vsel %vm901_vm4, %v2369_v16, %v4781_v12  ;;  %v4783_v21 = vld [vmem:[#allocation82_spill] sm:$0xff] }
 0x2be   : > { %v1302_v46 = vpop.permute.xlu1 %1301  ;;  %v3701_v33 = vadd.f32 %v1765_v45, %v1620_v27  ;;  %v4782_v27 = vld [vmem:[#allocation61_spill] sm:$0xff]  ;;  %v2416_v52 = vunpack.i.h.bf16 %v3376_v14  ;;  %v679_v2 = vadd.f32 %v647_v48, %v486_v55  ;;  %v943_v60 = vsel %vm3410_vm2, %v911_v15, 0.0  ;;  %v3750_v48 = vld [vmem:[%s2615_s24 + $0x48] sm:$0xff] }
 0x2bf   : > { %v3711_v24 = vsel %vm1335_vm9, %v1302_v46, %v2427_v35  ;;  %v1656_v57 = vpop.permute.xlu0 %1655  ;;  %v830_v40 = vmul.f32 %v4782_v27, %v782_v0  ;;  %v1442_v31 = vadd.f32 %v1426_v22, %v1281_v49  ;;  %v829_v26 = vmul.f32 %v4782_v27, %v781_v54 }
 0x2c0   : > { %4776 = vst [vmem:[#allocation75_spill] sm:$0xff] %v3701_v33  ;;  %v1684_v53 = vsel %vm1673_vm11, %v1656_v57, %v3574_v50  ;;  %1544 = vrot.lane.b32.xlu1 %v1488_v44, %s2560_s26  ;;  %v942_v14 = vsel %vm3417_vm3, %v910_v39, 0.0  ;;  %v4784_v44 = vld [vmem:[#allocation102_spill] sm:$0xff]  ;;  %v678_v43 = vadd.f32 %v646_v11, %v485_v4  ;;  %v1345_v12 = vsel %vm1335_vm9, %v3395_v5, %v2416_v52  ;;  %v3759_v4 = vld [vmem:[%s2615_s24 + $0x40] sm:$0xff] }
 0x2c1   : > { %v1716_v25 = vsel %vm3464_vm7, %v1684_v53, 0.0  ;;  %v1184_v22 = vsel %vm1174_vm8, %v4784_v44, %v2393_v1  ;;  %v990_v7 = vmul.f32 %v4783_v21, %v942_v14  ;;  %v846_v58 = vadd.f32 %v830_v40, %v679_v2  ;;  %v4785_v57 = vld [vmem:[#allocation94_spill] sm:$0xff] }
 0x2c2   : > { %v1764_v50 = vmul.f32 %v3391_v3, %v1716_v25  ;;  %v1559_v45 = vpop.permute.xlu1 %1558  ;;  %v991_v3 = vmul.f32 %v4783_v21, %v943_v60  ;;  %v1055_v59 = vmul.f32 %v3750_v48, %v4785_v57  ;;  %v845_v49 = vadd.f32 %v829_v26, %v678_v43  ;;  %v3776_v25 = vld [vmem:[%s4518_s1] sm:$0xff] }
 0x2c3   : > { %v1587_v16 = vsel %vm1576_vm10, %v1559_v45, %v3645_v63  ;;  %v3736_v35 = vpop.permute.xlu0 %1651  ;;  %v1183_v63 = vsel %vm1174_vm8, %v3245_v30, %v4784_v44  ;;  %v1054_v11 = vmul.f32 %v3759_v4, %v4785_v57  ;;  %v1216_v30 = vsel %vm3439_vm5, %v1184_v22, 0.0 }
 0x2c4   : > { %v1619_v55 = vadd.f32 %v1587_v16, %v1442_v31  ;;  %1637 = vrot.lane.b32.xlu1 %v3595_v34, %s2558_s25  ;;  %v1007_v54 = vadd.f32 %v991_v3, %v846_v58  ;;  %v1215_v5 = vsel %vm3464_vm7, %v1183_v63, 0.0  ;;  %v1264_v39 = vmul.f32 %v3315_v17, %v1216_v30  ;;  %v2508_v31 = vld [vmem:[%s4518_s1 + $0x30] sm:$0xff]  ;;  %v2511_v58 = vld [vmem:[%s4518_s1 + $0x20] sm:$0xff] }
 0x2c5   : > { %v1006_v27 = vadd.f32 %v990_v7, %v845_v49  ;;  %v1263_v40 = vmul.f32 %v3315_v17, %v1215_v5  ;;  %v4788_v14 = vmov 9   ;;  %v3801_v7 = vld [vmem:[%s2615_s24 + $0x18] sm:$0xff]  ;;  %v4790_v49 = vmov 0.0   ;;  %v3830_v5 = vld [vmem:[%s2615_s24 + $0x10] sm:$0xff] }
 0x2c6   : > { %v1300_v15 = vpop.permute.xlu1 %1299  ;;  %v3756_v1 = vadd.f32 %v1764_v50, %v1619_v55  ;;  %v1071_v52 = vadd.f32 %v1055_v59, %v1007_v54  ;;  %v1486_v50 = vmul.f32 %v3595_v34, %v3344_v10  ;;  %v2509_v10 = vld [vmem:[%s4518_s1 + $0x28] sm:$0xff] }
 0x2c7   : > { %v3766_v53 = vsel %vm1335_vm9, %v1300_v15, %v1302_v46  ;;  %v3768_v0 = vpop.permute.xlu0 %1385  ;;  %v1377_v46 = vsel %vm3410_vm2, %v1345_v12, 0.0  ;;  %v1070_v26 = vadd.f32 %v1054_v11, %v1006_v27  ;;  %v4791_v11 = vld [vmem:[#allocation110_spill] sm:$0xff]  ;;  %v3839_v27 = vld [vmem:[%s2615_s24 + $0x30] sm:$0xff] }
 0x2c8   : > { %4786 = vst [vmem:[#allocation74_spill] sm:$0xff] %v3756_v1  ;;  %4787 = vst [vmem:[#allocation85_spill] sm:$0xff] %v3768_v0  ;;  %1723 = vperm.xlu1 %2443, %v3776_v25   ;;  %v1425_v45 = vmul.f32 %v3424_v42, %v1377_v46  ;;  %v1280_v17 = vadd.f32 %v1264_v39, %v1071_v52  ;;  %v1484_v30 = vmul.f32 %v3801_v7, %v4791_v11  ;;  %v4792_v39 = vmov 1   ;;  %v4793_v52 = vld [vmem:[#allocation8_spill] sm:$0xff] }
 0x2c9   : > { %v1279_v16 = vadd.f32 %v1263_v40, %v1070_v26  ;;  %v1485_v54 = vmul.f32 0.0, %v4791_v11  ;;  %v1968_v40 = vadd.f32 %v3839_v27, %v3479_v18  ;;  %v4809_v0 = vld [vmem:[#allocation72_spill] sm:$0xff] }
 0x2ca   : > { %1811 = vperm.xlu0 %2444, %v2508_v31   ;;  %v1555_v2 = vpop.permute.xlu1 %1554  ;;  %v1441_v21 = vadd.f32 %v1425_v45, %v1280_v17  ;;  %v2515_v45 = vld [vmem:[%s4518_s1 + $0x38] sm:$0xff]  ;;  %v4794_v31 = vld [vmem:[#allocation11_spill] sm:$0xff]  ;;  %v4795_v17 = vld [vmem:[#allocation12_spill] sm:$0xff] }
 0x2cb   : > { %v3788_v60 = vpop.permute.xlu0 %1649  ;;  %v1440_v22 = vadd.f32 %v3542_v61, %v1279_v16  ;;  %v2512_v61 = vld [vmem:[%s4518_s1 + $0x18] sm:$0xff]  ;;  %v388_v16 = vsel %vm380_vm0, %v4794_v31, %v4795_v17 }
 0x2cc   : > { %1540 = vrot.lane.b32.xlu1 %v1486_v50, %s2560_s26  ;;  %v2319_v50 = vunpack.i.h.bf16 %v4793_v52 }
 0x2cd   : > { %2450 = vset.pattern.permute.xlu1 %v4788_v14  ;;  %v4796_v14 = vld [vmem:[#allocation123_spill] sm:$0xff] }
 0x2ce   : > { %1807 = vperm.xlu0 %2444, %v2509_v10   ;;  %v1557_v42 = vpop.permute.xlu1 %1556 }
 0x2cf   : > { %v1586_v3 = vsel %vm1576_vm10, %v1555_v2, %v1557_v42  ;;  %v1553_v44 = vpop.permute.xlu0 %1552  ;;  %v3858_v42 = vld [vmem:[%s4521_s4 + $0x8] sm:$0xff] }
 0x2d0   : > { %v3797_v55 = vadd.f32 %v1586_v3, %v1441_v21  ;;  %v1585_v43 = vsel %vm1576_vm10, %v1553_v44, %v1555_v2  ;;  %1633 = vrot.lane.b32.xlu1 %v3801_v7, %s2558_s25  ;;  %v387_v2 = vsel %vm380_vm0, %v2319_v50, %v4794_v31  ;;  %v2421_v21 = vunpack.i.h.bf16 %v4796_v14  ;;  %4797 = vst [vmem:[#allocation42_spill] sm:$0xff] %v3858_v42  ;;  %v2516_v3 = vld [vmem:[%s4518_s1 + $0x10] sm:$0xff]  ;;  %v3885_v31 = vld [vmem:[%s4521_s4] sm:$0xff] }
 0x2d1   : > { %v3805_v63 = vadd.f32 %v1585_v43, %v1440_v22  ;;  %v1971_v44 = vadd.f32 %v3759_v4, %v3750_v48  ;;  %v419_v22 = vsel %vm3417_vm3, %v387_v2, 0.0  ;;  %v4798_v43 = vld [vmem:[#allocation47_spill] sm:$0xff]  ;;  %v4802_v48 = vld [vmem:[#allocation126_spill] sm:$0xff]  ;;  %4803 = vst [vmem:[#allocation89_spill] sm:$0xff] %v3885_v31 }
 0x2d2   : > { %1803 = vperm.xlu0 %2444, %v2511_v58   ;;  %v3810_v57 = vpop.permute.xlu1 %1295  ;;  %v2343_v58 = vunpack.i.h.bf16 %v4798_v43  ;;  %v1687_v4 = vsel %vm1673_vm11, %v4802_v48, %v2421_v21  ;;  %v4804_v21 = vld [vmem:[#allocation38_spill] sm:$0xff] }
 0x2d3   : > { %v3843_v46 = vpop.permute.xlu0 %2439 }
 0x2d6   : > { %1799 = vperm.xlu0 %2444, %v2512_v61   ;;  %v3815_v59 = vpop.permute.xlu1 %2434  ;;  %v420_v61 = vsel %vm3410_vm2, %v388_v16, 0.0 }
 0x2d7   : > { %4789 = vst [vmem:[#allocation13_spill] sm:$0xff] %v3815_v59  ;;  %v2436_v12 = vunpack.i.l.bf16 %v3815_v59 }
 0x2d9   : > { %v3820_v15 = vsel %vm1335_vm9, %v3810_v57, %v2436_v12  ;;  %v4799_v12 = vld [vmem:[#allocation37_spill] sm:$0xff] }
 0x2da   : > { %2446 = vrot.lane.b32.xlu0 %v4790_v49, %s2558_s25  ;;  %v1646_v10 = vpop.permute.xlu1 %1645  ;;  %v4800_v49 = vld [vmem:[#allocation36_spill] sm:$0xff] }
 0x2de   : > { %1536 = vrot.lane.b32.xlu0 %v1484_v30, %s2560_s26  ;;  %v644_v30 = vsel %vm637_vm6, %v4800_v49, %v4799_v12  ;;  %v4806_v49 = vld [vmem:[#allocation67_spill] sm:$0xff] }
 0x2e2   : > { %1538 = vrot.lane.b32.xlu0 %v1485_v54, %s2560_s26  ;;  %v1483_v54 = vmul.f32 %v3830_v5, %v4791_v11 }
 0x2e6   : > { %1631 = vrot.lane.b32.xlu0 %v3830_v5, %s2558_s25 }
 0x2ea   : > { %1791 = vperm.xlu0 %2444, %v3560_v13  }
 0x2ee   : > { %1627 = vrot.lane.b32.xlu0 %v3590_v56, %s2558_s25 }
 0x2ef   : > { %2452 = vset.pattern.permute.xlu0 %v4792_v39 }
 0x2f4   : > { %1969 = vadd.xlane.f32.xlu1 %v1968_v40  ;;  %v4801_v40 = vld [vmem:[#allocation19_spill] sm:$0xff] }
 0x2f5   : > { %v483_v50 = vmul.f32 %v4801_v40, %v419_v22  ;;  %v484_v11 = vmul.f32 %v4801_v40, %v420_v61  ;;  %v4805_v22 = vld [vmem:[#allocation50_spill] sm:$0xff]  ;;  %v2365_v40 = vunpack.i.h.bf16 %v4806_v49 }
 0x2f6   : > { %v747_v61 = vsel %vm740_vm1, %v2343_v58, %v4805_v22 }
 0x2f7   : > { %v676_v16 = vadd.f32 %v644_v30, %v483_v50  ;;  %v3912_v50 = vld [vmem:[%s2615_s24 + $0x70] sm:$0xff]  ;;  %v908_v1 = vsel %vm901_vm4, %v2365_v40, %v4809_v0 }
 0x300   : > { %v1964_v13 = vpop.xlane.xlu0 %1963 }
 0x301   : > { %v1984_v26 = vmul.f32 0.00390625, %v1964_v13 }
 0x303   : > { %v2000_v39 = vmul.f32 %v3858_v42, %v1984_v26  ;;  %v1686_v26 = vsel %vm1673_vm11, %v3579_v41, %v4802_v48  ;;  %v4807_v41 = vld [vmem:[#allocation116_spill] sm:$0xff] }
 0x304   : > { %v3880_v13 = vpop.permute.xlu0 %1293  ;;  %v1481_v48 = vmul.f32 %v3590_v56, %v4807_v41  ;;  %v1718_v58 = vsel %vm3464_vm7, %v1686_v26, 0.0  ;;  %v4808_v26 = vld [vmem:[#allocation51_spill] sm:$0xff] }
 0x305   : > { %1815 = vperm.xlu1 %2450, %v2515_v45   ;;  %v2432_v45 = vunpack.i.h.bf16 %v3654_v51  ;;  %v1974_v51 = vadd.f32 %v3671_v62, %v3619_v19  ;;  %v1719_v19 = vsel %vm3439_vm5, %v1687_v4, 0.0  ;;  %v1682_v4 = vsel %vm1673_vm11, %v3788_v60, %v3736_v35 }
 0x306   : > { %v748_v42 = vsel %vm740_vm1, %v4805_v22, %v4808_v26  ;;  %v4818_v26 = vld [vmem:[#allocation98_spill] sm:$0xff] }
 0x307   : > { %v1683_v62 = vsel %vm1673_vm11, %v3736_v35, %v2432_v45  ;;  %v4810_v35 = vld [vmem:[#allocation59_spill] sm:$0xff] }
 0x308   : > { %v1644_v33 = vpop.permute.xlu0 %1643  ;;  %v1715_v40 = vsel %vm3439_vm5, %v1683_v62, 0.0 }
 0x309   : > { %1795 = vperm.xlu1 %2450, %v2516_v3   ;;  %v645_v3 = vsel %vm637_vm6, %v4799_v12, %v4804_v21  ;;  %v2441_v12 = vunpack.i.l.bf16 %v3843_v46 }
 0x30a   : > { %v677_v22 = vadd.f32 %v645_v3, %v484_v11  ;;  %v4811_v11 = vld [vmem:[#allocation71_spill] sm:$0xff] }
 0x30b   : > { %v909_v3 = vsel %vm901_vm4, %v4809_v0, %v4811_v11  ;;  %v2389_v0 = vunpack.i.h.bf16 %v4818_v26 }
 0x30c   : > { %v1961_v2 = vpop.xlane.xlu1 %1960 }
 0x30d   : > { %v1983_v17 = vmul.f32 0.00390625, %v1961_v2  ;;  %1972 = vadd.xlane.f32.xlu0 %v1971_v44  ;;  %1534 = vrot.lane.b32.xlu1 %v1483_v54, %s2560_s26  ;;  %v2009_v44 = vsel %vm2007_vm12, %v2000_v39, 0.0  ;;  %v3915_v2 = vld [vmem:[%s2615_s24 + $0x78] sm:$0xff] }
 0x30e   : > { %v1980_v39 = vadd.f32 %v3915_v2, %v3912_v50 }
 0x30f   : > { %v1999_v54 = vmul.f32 %v3885_v31, %v1983_v17  ;;  %v779_v31 = vsel %vm3464_vm7, %v747_v61, 0.0  ;;  %v1714_v61 = vsel %vm3464_vm7, %v1682_v4, 0.0  ;;  %v4813_v4 = vld [vmem:[#allocation100_spill] sm:$0xff] }
 0x310   : > { %v1748_v30 = vpop.permute.xlu1 %1747  ;;  %v827_v60 = vmul.f32 %v4810_v35, %v779_v31  ;;  %v940_v31 = vsel %vm3417_vm3, %v908_v1, 0.0 }
 0x311   : > { %v2008_v17 = vsel %vm2007_vm12, %v1999_v54, 0.0  ;;  %v1766_v45 = vmul.f32 %v1748_v30, %v1718_v58  ;;  %v1767_v21 = vmul.f32 %v1748_v30, %v1719_v19  ;;  %1975 = vadd.xlane.f32.xlu0 %v1974_v51  ;;  %1530 = vrot.lane.b32.xlu1 %v1481_v48, %s2560_s26  ;;  %v1482_v54 = vmul.f32 0.0, %v4807_v41 }
 0x312   : > { %v3931_v59 = vadd.f32 %v2009_v44, %v2008_v17  ;;  %v1681_v19 = vsel %vm1673_vm11, %v1646_v10, %v2441_v12  ;;  %v1680_v58 = vsel %vm1673_vm11, %v1644_v33, %v1646_v10  ;;  %v4812_v12 = vld [vmem:[#allocation84_spill] sm:$0xff]  ;;  %v4814_v17 = vld [vmem:[#allocation105_spill] sm:$0xff]  ;;  %v843_v10 = vadd.f32 %v827_v60, %v676_v16 }
 0x313   : > { %v3936_v51 = vadd.f32 %v1766_v45, %v3640_v20  ;;  %v3939_v48 = vadd.f32 %v1767_v21, %v3566_v29  ;;  %v780_v29 = vsel %vm3439_vm5, %v748_v42, 0.0  ;;  %v988_v62 = vmul.f32 %v4812_v12, %v940_v31  ;;  %v4817_v42 = vld [vmem:[#allocation88_spill] sm:$0xff] }
 0x314   : > { %v1740_v44 = vpop.permute.xlu1 %1739  ;;  %v1181_v1 = vsel %vm1174_vm8, %v4814_v17, %v4813_v4  ;;  %v828_v33 = vmul.f32 %v4810_v35, %v780_v29  ;;  %v1052_v21 = vmul.f32 %v3839_v27, %v4817_v42  ;;  %v941_v16 = vsel %vm3410_vm2, %v909_v3, 0.0  ;;  %v4819_v31 = vld [vmem:[#allocation112_spill] sm:$0xff] }
 0x315   : > { %v1762_v20 = vmul.f32 %v1740_v44, %v1714_v61  ;;  %v1763_v30 = vmul.f32 %v1740_v44, %v1715_v40  ;;  %1532 = vrot.lane.b32.xlu1 %v1482_v54, %s2560_s26  ;;  %1981 = vadd.xlane.f32.xlu0 %v1980_v39  ;;  %v1712_v54 = vsel %vm3464_vm7, %v1680_v58, 0.0  ;;  %v1713_v61 = vsel %vm3439_vm5, %v1681_v19, 0.0 }
 0x316   : > { %v989_v27 = vmul.f32 %v4812_v12, %v941_v16  ;;  %v1004_v60 = vadd.f32 %v988_v62, %v843_v10  ;;  %v1182_v44 = vsel %vm1174_vm8, %v4813_v4, %v2389_v0  ;;  %v844_v58 = vadd.f32 %v828_v33, %v677_v22  ;;  %v1547_v22 = vpop.permute.xlu0 %1546 }
 0x317   : > { %v3961_v45 = vadd.f32 %v1762_v20, %v3805_v63  ;;  %v3964_v39 = vadd.f32 %v1763_v30, %v3797_v55  ;;  %v1213_v63 = vsel %vm3464_vm7, %v1181_v1, 0.0  ;;  %v1053_v20 = vmul.f32 %v3479_v18, %v4817_v42 }
 0x318   : > { %v1736_v40 = vpop.permute.xlu1 %1735  ;;  %v1261_v19 = vmul.f32 %v4819_v31, %v1213_v63  ;;  %v1068_v30 = vadd.f32 %v1052_v21, %v1004_v60  ;;  %v1214_v11 = vsel %vm3439_vm5, %v1182_v44, 0.0  ;;  %v1005_v3 = vadd.f32 %v989_v27, %v844_v58  ;;  %v4825_v27 = vld [vmem:[#allocation129_spill] sm:$0xff] }
 0x319   : > { %4815 = vst [vmem:[#allocation104_spill] sm:$0xff] %v3961_v45  ;;  %4816 = vst [vmem:[#allocation21_spill] sm:$0xff] %v3964_v39  ;;  %v1760_v55 = vmul.f32 %v1736_v40, %v1712_v54  ;;  %v1761_v35 = vmul.f32 %v1736_v40, %v1713_v61  ;;  %1625 = vrot.lane.b32.xlu1 %v3664_v38, %s2558_s25  ;;  %v1262_v12 = vmul.f32 %v4819_v31, %v1214_v11  ;;  %v4821_v21 = vmov 0   ;;  %v4828_v11 = vld [vmem:[#allocation14_spill] sm:$0xff] }
 0x31a   : > { %v1277_v62 = vadd.f32 %v1261_v19, %v1068_v30  ;;  %v1480_v4 = vmul.f32 %v3664_v38, %v4807_v41  ;;  %v1069_v17 = vadd.f32 %v1053_v20, %v1005_v3  ;;  %v1977_v60 = vadd.f32 %v4825_v27, %v3485_v9  ;;  %v4827_v19 = vld [vmem:[#allocation3_spill] sm:$0xff]  ;;  %v4829_v3 = vld [vmem:[#allocation4_spill] sm:$0xff]  ;;  %v4878_v39 = vld [vmem:[#allocation78_spill] sm:$0xff] }
 0x31b   : > { %v2314_v58 = vunpack.i.h.bf16 %v4827_v19  ;;  %v2318_v20 = vunpack.i.l.bf16 %v4793_v52  ;;  %v2313_v30 = vunpack.i.l.bf16 %v4827_v19  ;;  %v2329_v9 = vunpack.i.h.bf16 %v4828_v11 }
 0x31c   : > { %v3985_v29 = vpop.permute.xlu1 %1731  ;;  %v1438_v18 = vadd.f32 %v3638_v36, %v1277_v62  ;;  %v1278_v10 = vadd.f32 %v1262_v12, %v1069_v17  ;;  %v4006_v36 = vld [vmem:[%s4521_s4 + $0x10] sm:$0xff] }
 0x31d   : > { %4820 = vst [vmem:[#allocation52_spill] sm:$0xff] %v3985_v29  ;;  %1787 = vperm.xlu1 %2450, %v3776_v25   ;;  %4824 = vst [vmem:[#allocation39_spill] sm:$0xff] %v4006_v36  ;;  %v4830_v12 = vld [vmem:[#allocation5_spill] sm:$0xff]  ;;  %v4885_v29 = vld [vmem:[#allocation90_spill] sm:$0xff] }
 0x31e   : > { %v1439_v0 = vadd.f32 %v3582_v32, %v1278_v10  ;;  %v382_v62 = vsel %vm380_vm0, %v4830_v12, %v4829_v3  ;;  %v4835_v10 = vld [vmem:[#allocation15_spill] sm:$0xff] }
 0x320   : > { %v1549_v1 = vpop.permute.xlu1 %1548 }
 0x321   : > { %v1583_v33 = vsel %vm1576_vm10, %v1547_v22, %v1549_v1  ;;  %1528 = vrot.lane.b32.xlu1 %v1480_v4, %s2560_s26  ;;  %v4831_v4 = vld [vmem:[#allocation7_spill] sm:$0xff] }
 0x322   : > { %v1615_v42 = vadd.f32 %v1583_v33, %v1438_v18  ;;  %2451 = vset.pattern.permute.xlu1 %v4821_v21  ;;  %v4834_v33 = vld [vmem:[#allocation10_spill] sm:$0xff] }
 0x324   : > { %v1551_v25 = vpop.permute.xlu1 %1550  ;;  %v3998_v54 = vadd.f32 %v1760_v55, %v1615_v42  ;;  %v395_v42 = vsel %vm380_vm0, %v2329_v9, %v4835_v10  ;;  %v4841_v9 = vld [vmem:[#allocation18_spill] sm:$0xff] }
 0x325   : > { %v1584_v38 = vsel %vm1576_vm10, %v1549_v1, %v1551_v25  ;;  %v4833_v1 = vld [vmem:[#allocation9_spill] sm:$0xff]  ;;  %v4837_v25 = vld [vmem:[#allocation16_spill] sm:$0xff] }
 0x326   : > { %4822 = vst [vmem:[#allocation53_spill] sm:$0xff] %v3998_v54  ;;  %v1616_v41 = vadd.f32 %v1584_v38, %v1439_v0  ;;  %v385_v18 = vsel %vm380_vm0, %v2318_v20, %v4833_v1  ;;  %v386_v52 = vsel %vm380_vm0, %v4833_v1, %v4834_v33  ;;  %v396_v0 = vsel %vm380_vm0, %v4835_v10, %v4837_v25  ;;  %v4838_v38 = vld [vmem:[#allocation23_spill] sm:$0xff]  ;;  %v4845_v1 = vld [vmem:[#allocation26_spill] sm:$0xff]  ;;  %v4846_v33 = vld [vmem:[#allocation29_spill] sm:$0xff] }
 0x327   : > { %v417_v19 = vsel %vm3417_vm3, %v385_v18, 0.0  ;;  %v428_v20 = vsel %vm3410_vm2, %v396_v0, 0.0  ;;  %v4848_v25 = vld [vmem:[#allocation22_spill] sm:$0xff]  ;;  %v4863_v54 = vld [vmem:[#allocation55_spill] sm:$0xff] }
 0x328   : > { %v4001_v61 = vadd.f32 %v1761_v35, %v1616_v41  ;;  %v4012_v55 = vpop.permute.xlu1 %1727  ;;  %v2338_v41 = vunpack.i.h.bf16 %v4838_v38  ;;  %v4857_v38 = vld [vmem:[#allocation43_spill] sm:$0xff] }
 0x329   : > { %4826 = vst [vmem:[#allocation41_spill] sm:$0xff] %v4012_v55  ;;  %v4864_v55 = vld [vmem:[#allocation57_spill] sm:$0xff] }
 0x32a   : > { %4823 = vst [vmem:[#allocation40_spill] sm:$0xff] %v4001_v61  ;;  %v743_v18 = vsel %vm740_vm1, %v2338_v41, %v4845_v1  ;;  %v4855_v41 = vld [vmem:[#allocation35_spill] sm:$0xff] }
 0x32c   : > { %v4017_v35 = vpop.permute.xlu1 %1289 }
 0x32d   : > { %v4921_v6 = vld [vmem:[#allocation53_spill] sm:$0xff] }
 0x330   : > { %v4019_v31 = vpop.permute.xlu1 %1639 }
 0x334   : > { %v4040_v21 = vpop.permute.xlu1 %1287 }
 0x335   : > { %4836 = vst [vmem:[#allocation76_spill] sm:$0xff] %v4040_v21  ;;  %v4853_v21 = vld [vmem:[#allocation33_spill] sm:$0xff] }
 0x33d   : > { %v1967_v40 = vpop.xlane.xlu0 %1966 }
 0x33e   : > { %v1985_v16 = vmul.f32 0.00390625, %v1967_v40  ;;  %v4048_v40 = vsel %vm380_vm0, %v2313_v30, %v4830_v12  ;;  %v4840_v30 = vld [vmem:[#allocation17_spill] sm:$0xff] }
 0x33f   : > { %4839 = vst [vmem:[#allocation73_spill] sm:$0xff] %v4048_v40  ;;  %v4842_v12 = vld [vmem:[#allocation25_spill] sm:$0xff]  ;;  %v4856_v40 = vld [vmem:[#allocation44_spill] sm:$0xff] }
 0x340   : > { %v2001_v63 = vmul.f32 %v4006_v36, %v1985_v16 }
 0x342   : > { %v2011_v32 = vsel %vm2007_vm12, %v2001_v63, 0.0  ;;  %v414_v63 = vsel %vm3410_vm2, %v382_v62, 0.0  ;;  %v4843_v62 = vld [vmem:[#allocation24_spill] sm:$0xff] }
 0x343   : > { %v4015_v44 = vadd.f32 %v2011_v32, %v3931_v59  ;;  %v4832_v59 = vld [vmem:[#allocation6_spill] sm:$0xff]  ;;  %v478_v11 = vmul.f32 %v4840_v30, %v414_v63  ;;  %v4849_v63 = vld [vmem:[#allocation31_spill] sm:$0xff] }
 0x344   : > { %v384_v17 = vsel %vm380_vm0, %v4832_v59, %v4831_v4  ;;  %v383_v22 = vsel %vm380_vm0, %v2314_v58, %v4832_v59  ;;  %v427_v58 = vsel %vm3417_vm3, %v395_v42, 0.0  ;;  %v742_v4 = vsel %vm740_vm1, %v4843_v62, %v4842_v12  ;;  %v4854_v30 = vld [vmem:[#allocation54_spill] sm:$0xff]  ;;  %v4862_v62 = vld [vmem:[#allocation56_spill] sm:$0xff] }
 0x345   : > { %1978 = vadd.xlane.f32.xlu1 %v1977_v60  ;;  %v416_v16 = vsel %vm3410_vm2, %v384_v17, 0.0  ;;  %v4054_v27 = vpop.permute.xlu0 %1811  ;;  %v418_v60 = vsel %vm3410_vm2, %v386_v52, 0.0  ;;  %v415_v32 = vsel %vm3417_vm3, %v383_v22, 0.0  ;;  %v4844_v17 = vld [vmem:[#allocation20_spill] sm:$0xff]  ;;  %v491_v0 = vmul.f32 %v4848_v25, %v427_v58 }
 0x346   : > { %v479_v3 = vmul.f32 %v4841_v9, %v415_v32  ;;  %v480_v59 = vmul.f32 %v4841_v9, %v416_v16  ;;  %v481_v22 = vmul.f32 %v4844_v17, %v417_v19  ;;  %v4847_v52 = vld [vmem:[#allocation28_spill] sm:$0xff]  ;;  %v482_v42 = vmul.f32 %v4844_v17, %v418_v60  ;;  %v4850_v32 = vld [vmem:[#allocation30_spill] sm:$0xff]  ;;  %v4084_v16 = vpop.permute.xlu1 %1542 }
 0x347   : > { %v639_v10 = vsel %vm637_vm6, %v4847_v52, %v4846_v33  ;;  %v640_v36 = vsel %vm637_vm6, %v4850_v32, %v4849_v63  ;;  %v2342_v12 = vunpack.i.l.bf16 %v4798_v43  ;;  %v492_v19 = vmul.f32 %v4848_v25, %v428_v20  ;;  %v4851_v33 = vld [vmem:[#allocation32_spill] sm:$0xff]  ;;  %v4852_v17 = vld [vmem:[#allocation34_spill] sm:$0xff] }
 0x348   : > { %v774_v9 = vsel %vm3439_vm5, %v742_v4, 0.0  ;;  %v641_v60 = vsel %vm637_vm6, %v4849_v63, %v4851_v33  ;;  %v671_v58 = vadd.f32 %v639_v10, %v478_v11  ;;  %v642_v32 = vsel %vm637_vm6, %v4853_v21, %v4852_v17  ;;  %v4858_v10 = vld [vmem:[#allocation46_spill] sm:$0xff]  ;;  %v4860_v33 = vld [vmem:[#allocation48_spill] sm:$0xff] }
 0x349   : > { %v2353_v43 = vunpack.i.h.bf16 %v4854_v30  ;;  %v775_v52 = vsel %vm3464_vm7, %v743_v18, 0.0  ;;  %v4099_v20 = vpop.permute.xlu0 %1807  ;;  %v672_v25 = vadd.f32 %v640_v36, %v479_v3  ;;  %v643_v4 = vsel %vm637_vm6, %v4852_v17, %v4855_v41  ;;  %v4859_v30 = vld [vmem:[#allocation45_spill] sm:$0xff] }
 0x34a   : > { %v652_v11 = vsel %vm637_vm6, %v4857_v38, %v4856_v40  ;;  %v744_v21 = vsel %vm740_vm1, %v4845_v1, %v4858_v10  ;;  %v673_v63 = vadd.f32 %v641_v60, %v480_v59  ;;  %v653_v18 = vsel %vm637_vm6, %v4856_v40, %v4859_v30  ;;  %v4861_v3 = vld [vmem:[#allocation49_spill] sm:$0xff]  ;;  %v4865_v1 = vld [vmem:[#allocation58_spill] sm:$0xff]  ;;  %v4127_v30 = vpop.permute.xlu1 %1544 }
 0x34b   : > { %v745_v36 = vsel %vm740_vm1, %v2342_v12, %v4860_v33  ;;  %v746_v41 = vsel %vm740_vm1, %v4860_v33, %v4861_v3  ;;  %v674_v17 = vadd.f32 %v642_v32, %v481_v22  ;;  %v756_v38 = vsel %vm740_vm1, %v4863_v54, %v4862_v62  ;;  %v4867_v32 = vld [vmem:[#allocation64_spill] sm:$0xff] }
 0x34c   : > { %v822_v61 = vmul.f32 %v4864_v55, %v774_v9  ;;  %v823_v59 = vmul.f32 %v4865_v1, %v775_v52  ;;  %v675_v60 = vadd.f32 %v643_v4, %v482_v42  ;;  %v684_v10 = vadd.f32 %v652_v11, %v491_v0  ;;  %v4866_v42 = vld [vmem:[#allocation60_spill] sm:$0xff]  ;;  %v4874_v55 = vld [vmem:[#allocation70_spill] sm:$0xff] }
 0x34d   : > { %v776_v40 = vsel %vm3439_vm5, %v744_v21, 0.0  ;;  %v755_v12 = vsel %vm740_vm1, %v2353_v43, %v4863_v54  ;;  %v685_v33 = vadd.f32 %v653_v18, %v492_v19  ;;  %v778_v22 = vsel %vm3439_vm5, %v746_v41, 0.0  ;;  %v4139_v43 = vpop.permute.xlu0 %1803  ;;  %v4869_v18 = vld [vmem:[#allocation77_spill] sm:$0xff] }
 0x34e   : > { %v824_v62 = vmul.f32 %v4865_v1, %v776_v40  ;;  %v777_v9 = vsel %vm3464_vm7, %v745_v36, 0.0  ;;  %v788_v52 = vsel %vm3439_vm5, %v756_v38, 0.0  ;;  %v2360_v4 = vunpack.i.h.bf16 %v4867_v32  ;;  %4868 = vst [vmem:[#allocation61_spill] sm:$0xff] %v4139_v43  ;;  %v4870_v41 = vld [vmem:[#allocation65_spill] sm:$0xff]  ;;  %v4871_v1 = vld [vmem:[#allocation66_spill] sm:$0xff]  ;;  %v4872_v38 = vld [vmem:[#allocation63_spill] sm:$0xff] }
 0x34f   : > { %v825_v0 = vmul.f32 %v4866_v42, %v777_v9  ;;  %v2364_v54 = vunpack.i.l.bf16 %v4806_v49  ;;  %v838_v19 = vadd.f32 %v822_v61, %v671_v58  ;;  %v839_v11 = vadd.f32 %v823_v59, %v672_v25  ;;  %v4873_v9 = vld [vmem:[#allocation68_spill] sm:$0xff]  ;;  %v4875_v59 = vld [vmem:[#allocation69_spill] sm:$0xff]  ;;  %v4877_v43 = vld [vmem:[#allocation62_spill] sm:$0xff] }
 0x350   : > { %v787_v21 = vsel %vm3464_vm7, %v755_v12, 0.0  ;;  %v2375_v3 = vunpack.i.h.bf16 %v4869_v18  ;;  %v904_v36 = vsel %vm901_vm4, %v2360_v4, %v4870_v41  ;;  %v903_v40 = vsel %vm901_vm4, %v4872_v38, %v4871_v1  ;;  %v4876_v18 = vld [vmem:[#allocation79_spill] sm:$0xff] }
 0x351   : > { %v905_v49 = vsel %vm901_vm4, %v4870_v41, %v4873_v9  ;;  %v906_v61 = vsel %vm901_vm4, %v2364_v54, %v4874_v55  ;;  %v840_v58 = vadd.f32 %v824_v62, %v673_v63  ;;  %v826_v25 = vmul.f32 %v4866_v42, %v778_v22  ;;  %v4165_v54 = vpop.permute.xlu1 %1637  ;;  %v4879_v62 = vld [vmem:[#allocation80_spill] sm:$0xff] }
 0x352   : > { %v907_v12 = vsel %vm901_vm4, %v4874_v55, %v4875_v59  ;;  %v916_v4 = vsel %vm901_vm4, %v2375_v3, %v4876_v18  ;;  %v841_v45 = vadd.f32 %v825_v0, %v674_v17  ;;  %v835_v1 = vmul.f32 %v4877_v43, %v787_v21  ;;  %v4881_v21 = vld [vmem:[#allocation81_spill] sm:$0xff]  ;;  %v4883_v59 = vld [vmem:[#allocation87_spill] sm:$0xff] }
 0x353   : > { %v836_v38 = vmul.f32 %v4877_v43, %v788_v52  ;;  %v917_v41 = vsel %vm901_vm4, %v4876_v18, %v4878_v39  ;;  %v935_v63 = vsel %vm3410_vm2, %v903_v40, 0.0  ;;  %v937_v55 = vsel %vm3410_vm2, %v905_v49, 0.0  ;;  %v4181_v43 = vpop.permute.xlu0 %1799  ;;  %v4882_v40 = vld [vmem:[#allocation83_spill] sm:$0xff] }
 0x354   : > { %v936_v22 = vsel %vm3417_vm3, %v904_v36, 0.0  ;;  %v938_v17 = vsel %vm3417_vm3, %v906_v61, 0.0  ;;  %v985_v42 = vmul.f32 %v4879_v62, %v937_v55  ;;  %v939_v39 = vsel %vm3410_vm2, %v907_v12, 0.0  ;;  %4880 = vst [vmem:[#allocation82_spill] sm:$0xff] %v4181_v43  ;;  %v4884_v12 = vld [vmem:[#allocation115_spill] sm:$0xff] }
 0x355   : > { %v984_v52 = vmul.f32 %v4879_v62, %v936_v22  ;;  %v948_v0 = vsel %vm3417_vm3, %v916_v4, 0.0  ;;  %v983_v3 = vmul.f32 %v4881_v21, %v935_v63  ;;  %v986_v9 = vmul.f32 %v4882_v40, %v938_v17 }
 0x356   : > { %v987_v36 = vmul.f32 %v4882_v40, %v939_v39  ;;  %v949_v49 = vsel %vm3410_vm2, %v917_v41, 0.0  ;;  %v842_v61 = vadd.f32 %v826_v25, %v675_v60  ;;  %v996_v18 = vmul.f32 %v4883_v59, %v948_v0  ;;  %v4886_v41 = vld [vmem:[#allocation106_spill] sm:$0xff]  ;;  %v4197_v25 = vpop.permute.xlu1 %1723 }
 0x357   : > { %v997_v55 = vmul.f32 %v4883_v59, %v949_v49  ;;  %v2409_v22 = vunpack.i.l.bf16 %v4884_v12  ;;  %v851_v62 = vadd.f32 %v835_v1, %v684_v10  ;;  %v852_v4 = vadd.f32 %v836_v38, %v685_v33  ;;  %v4887_v10 = vld [vmem:[#allocation86_spill] sm:$0xff]  ;;  %v4888_v1 = vld [vmem:[#allocation107_spill] sm:$0xff] }
 0x358   : > { %v1048_v43 = vmul.f32 %v3830_v5, %v4885_v29  ;;  %v1049_v63 = vmul.f32 %v3801_v7, %v4885_v29  ;;  %v1000_v39 = vadd.f32 %v984_v52, %v839_v11  ;;  %v1001_v40 = vadd.f32 %v985_v42, %v840_v58  ;;  %v4889_v29 = vld [vmem:[#allocation114_spill] sm:$0xff]  ;;  %v4209_v58 = vpop.permute.xlu0 %2446  ;;  %v4894_v12 = vld [vmem:[#allocation99_spill] sm:$0xff] }
 0x359   : > { %v2399_v60 = vunpack.i.h.bf16 %v4886_v41  ;;  %v4199_v0 = vadd.f32 %v983_v3, %v838_v19  ;;  %v1002_v49 = vadd.f32 %v986_v9, %v841_v45  ;;  %v1003_v59 = vadd.f32 %v987_v36, %v842_v61  ;;  %v4890_v45 = vld [vmem:[#allocation108_spill] sm:$0xff]  ;;  %v4892_v9 = vld [vmem:[#allocation91_spill] sm:$0xff] }
 0x35a   : > { %v4203_v33 = vmul.f32 %v3590_v56, %v4887_v10  ;;  %v1012_v5 = vadd.f32 %v996_v18, %v851_v62  ;;  %v1013_v38 = vadd.f32 %v997_v55, %v852_v4  ;;  %v1351_v11 = vsel %vm1335_vm9, %v4889_v29, %v2409_v22  ;;  %v4891_v56 = vld [vmem:[#allocation119_spill] sm:$0xff]  ;;  %v4893_v18 = vld [vmem:[#allocation92_spill] sm:$0xff] }
 0x35b   : > { %v1190_v7 = vsel %vm1174_vm8, %v4888_v1, %v2399_v60  ;;  %v4211_v52 = vadd.f32 %v1048_v43, %v1000_v39  ;;  %v4213_v19 = vadd.f32 %v1049_v63, %v1001_v40  ;;  %v1189_v42 = vsel %vm1174_vm8, %v4890_v45, %v4888_v1  ;;  %v4895_v39 = vld [vmem:[#allocation118_spill] sm:$0xff]  ;;  %v4240_v40 = vpop.permute.xlu1 %1540  ;;  %v4896_v60 = vld [vmem:[#allocation101_spill] sm:$0xff] }
 0x35c   : > { %v1350_v3 = vsel %vm1335_vm9, %v4891_v56, %v4889_v29  ;;  %v1060_v36 = vmul.f32 %v3912_v50, %v4892_v9  ;;  %v1061_v61 = vmul.f32 %v3915_v2, %v4892_v9  ;;  %v1050_v43 = vmul.f32 %v3595_v34, %v4893_v18  ;;  %v4898_v29 = vld [vmem:[#allocation96_spill] sm:$0xff]  ;;  %v4899_v9 = vld [vmem:[#allocation113_spill] sm:$0xff] }
 0x35d   : > { %v2388_v55 = vunpack.i.l.bf16 %v4818_v26  ;;  %v2384_v22 = vunpack.i.h.bf16 %v4894_v12  ;;  %v2383_v62 = vunpack.i.l.bf16 %v4894_v12  ;;  %v1222_v4 = vsel %vm3439_vm5, %v1190_v7, 0.0  ;;  %v4897_v7 = vld [vmem:[#allocation103_spill] sm:$0xff] }
 0x35e   : > { %v1383_v63 = vsel %vm3410_vm2, %v1351_v11, 0.0  ;;  %v1221_v50 = vsel %vm3464_vm7, %v1189_v42, 0.0  ;;  %v1270_v2 = vmul.f32 %v4895_v39, %v1222_v4  ;;  %v1382_v34 = vsel %vm3417_vm3, %v1350_v3, 0.0 }
 0x35f   : > { %v2420_v26 = vunpack.i.l.bf16 %v4796_v14  ;;  %v1051_v41 = vmul.f32 %v3598_v8, %v4893_v18  ;;  %v1178_v1 = vsel %vm1174_vm8, %v4896_v60, %v2384_v22  ;;  %v1179_v11 = vsel %vm1174_vm8, %v4898_v29, %v4897_v7  ;;  %v4252_v14 = vpop.permute.xlu0 %1536  ;;  %v4900_v8 = vld [vmem:[#allocation95_spill] sm:$0xff]  ;;  %v4901_v22 = vld [vmem:[#allocation93_spill] sm:$0xff] }
 0x360   : > { %v1269_v45 = vmul.f32 %v4895_v39, %v1221_v50  ;;  %v1076_v42 = vadd.f32 %v1060_v36, %v1012_v5  ;;  %v1077_v56 = vadd.f32 %v1061_v61, %v1013_v38  ;;  %v1180_v3 = vsel %vm1174_vm8, %v4897_v7, %v2388_v55  ;;  %v4902_v61 = vld [vmem:[#allocation120_spill] sm:$0xff]  ;;  %v4904_v39 = vld [vmem:[#allocation122_spill] sm:$0xff]  ;;  %v4906_v7 = vld [vmem:[#allocation117_spill] sm:$0xff] }
 0x361   : > { %v1431_v12 = vmul.f32 %v4899_v9, %v1383_v63  ;;  %v1066_v4 = vadd.f32 %v1050_v43, %v1002_v49  ;;  %v1177_v18 = vsel %vm1174_vm8, %v4900_v8, %v4896_v60  ;;  %v4260_v17 = vsel %vm1174_vm8, %v4901_v22, %v2383_v62  ;;  %v4903_v63 = vld [vmem:[#allocation124_spill] sm:$0xff] }
 0x362   : > { %v1430_v50 = vmul.f32 %v4899_v9, %v1382_v34  ;;  %v1211_v5 = vsel %vm3464_vm7, %v1179_v11, 0.0  ;;  %v1286_v38 = vadd.f32 %v1270_v2, %v1077_v56  ;;  %v1210_v36 = vsel %vm3439_vm5, %v1178_v1, 0.0  ;;  %v4905_v34 = vld [vmem:[#allocation125_spill] sm:$0xff]  ;;  %v4907_v1 = vld [vmem:[#allocation128_spill] sm:$0xff]  ;;  %v1634_v11 = vpop.permute.xlu1 %1633 }
 0x363   : > { %v1689_v49 = vsel %vm1673_vm11, %v4902_v61, %v2420_v26  ;;  %v1212_v43 = vsel %vm3439_vm5, %v1180_v3, 0.0  ;;  %v1285_v55 = vadd.f32 %v1269_v45, %v1076_v42  ;;  %v1592_v62 = vsel %vm1576_vm10, %v4904_v39, %v4903_v63  ;;  %v1539_v63 = vpop.permute.xlu0 %1538 }
 0x364   : > { %v1688_v60 = vsel %vm1673_vm11, %v4905_v34, %v4902_v61  ;;  %v1259_v2 = vmul.f32 %v4906_v7, %v1211_v5  ;;  %v1260_v29 = vmul.f32 %v4906_v7, %v1212_v43  ;;  %v1591_v26 = vsel %vm1576_vm10, %v4907_v1, %v4904_v39  ;;  %v4908_v5 = vld [vmem:[#allocation111_spill] sm:$0xff] }
 0x365   : > { %v1447_v56 = vadd.f32 %v1431_v12, %v1286_v38  ;;  %v1446_v3 = vadd.f32 %v1430_v50, %v1285_v55  ;;  %v1373_v45 = vsel %vm3410_vm2, %v3711_v24, 0.0  ;;  %v1372_v42 = vsel %vm3417_vm3, %v3766_v53, 0.0  ;;  %v4306_v55 = vld [vmem:[%s4521_s4 + $0x18] sm:$0xff] }
 0x366   : > { %v1721_v9 = vsel %vm3439_vm5, %v1689_v49, 0.0  ;;  %v1067_v8 = vadd.f32 %v1051_v41, %v1003_v59  ;;  %v1258_v61 = vmul.f32 %v4908_v5, %v1210_v36  ;;  %v1720_v43 = vsel %vm3464_vm7, %v1688_v60, 0.0  ;;  %v4909_v41 = vld [vmem:[#allocation127_spill] sm:$0xff] }
 0x367   : > { %v1624_v12 = vadd.f32 %v1592_v62, %v1447_v56  ;;  %v1208_v50 = vsel %vm3439_vm5, %v4260_v17, 0.0  ;;  %v1209_v24 = vsel %vm3464_vm7, %v1177_v18, 0.0  ;;  %v1623_v38 = vadd.f32 %v1591_v26, %v1446_v3  ;;  %v4910_v62 = vld [vmem:[#allocation121_spill] sm:$0xff] }
 0x368   : > { %v1371_v53 = vsel %vm3410_vm2, %v3820_v15, 0.0  ;;  %v1275_v59 = vadd.f32 %v1259_v2, %v1066_v4  ;;  %v1421_v36 = vmul.f32 %v4909_v41, %v1373_v45  ;;  %v1420_v49 = vmul.f32 %v4909_v41, %v1372_v42  ;;  %v4911_v42 = vld [vmem:[#allocation13_spill] sm:$0xff] }
 0x369   : > { %v1769_v34 = vmul.f32 %v4910_v62, %v1721_v9  ;;  %v1276_v60 = vadd.f32 %v1260_v29, %v1067_v8  ;;  %v1768_v18 = vmul.f32 %v4910_v62, %v1720_v43  ;;  %v1338_v15 = vsel %vm1335_vm9, %v3880_v13, %v3810_v57  ;;  %v4912_v62 = vld [vmem:[#allocation75_spill] sm:$0xff] }
 0x36a   : > { %v1257_v7 = vmul.f32 %v4908_v5, %v1209_v24  ;;  %v1274_v2 = vadd.f32 %v1258_v61, %v4213_v19  ;;  %v1419_v1 = vmul.f32 %v3685_v23, %v1371_v53  ;;  %v2442_v56 = vunpack.i.h.bf16 %v3843_v46  ;;  %v1632_v5 = vpop.permute.xlu0 %1631 }
 0x36b   : > { %v1785_v26 = vadd.f32 %v1769_v34, %v1624_v12  ;;  %v2448_v3 = vunpack.i.l.bf16 %v4209_v58  ;;  %v1784_v45 = vadd.f32 %v1768_v18, %v1623_v38  ;;  %v2437_v9 = vunpack.i.h.bf16 %v4911_v42 }
 0x36c   : > { %v1370_v57 = vsel %vm3417_vm3, %v1338_v15, 0.0  ;;  %v1437_v13 = vadd.f32 %v1421_v36, %v1276_v60  ;;  %v1436_v8 = vadd.f32 %v1420_v49, %v1275_v59  ;;  %v1679_v19 = vsel %vm1673_vm11, %v4019_v31, %v2442_v56  ;;  %v4913_v60 = vld [vmem:[#allocation74_spill] sm:$0xff]  ;;  %v4914_v15 = vld [vmem:[#allocation52_spill] sm:$0xff] }
 0x36d   : > { %v1582_v24 = vsel %vm1576_vm10, %v4084_v16, %v4127_v30  ;;  %v1678_v38 = vsel %vm1673_vm11, %v4165_v54, %v4019_v31  ;;  %v1435_v53 = vadd.f32 %v1419_v1, %v1274_v2  ;;  %v1418_v41 = vmul.f32 %v3685_v23, %v1370_v57  ;;  %v4915_v2 = vld [vmem:[#allocation21_spill] sm:$0xff]  ;;  %v4919_v57 = vld [vmem:[#allocation82_spill] sm:$0xff] }
 0x36e   : > { %v1831_v36 = vadd.f32 %v4054_v27, %v3939_v48  ;;  %v1581_v49 = vsel %vm1576_vm10, %v4240_v40, %v4084_v16  ;;  %v1711_v30 = vsel %vm3439_vm5, %v1679_v19, 0.0  ;;  %v1830_v31 = vadd.f32 %v4054_v27, %v3936_v51  ;;  %v4916_v1 = vld [vmem:[#allocation61_spill] sm:$0xff] }
 0x36f   : > { %v1676_v23 = vsel %vm1673_vm11, %v1632_v5, %v1634_v11  ;;  %v1337_v48 = vsel %vm1335_vm9, %v4017_v35, %v2437_v9  ;;  %v1614_v16 = vadd.f32 %v1582_v24, %v1437_v13  ;;  %v1710_v40 = vsel %vm3464_vm7, %v1678_v38, 0.0  ;;  %v4918_v9 = vld [vmem:[#allocation40_spill] sm:$0xff]  ;;  %v4922_v38 = vld [vmem:[#allocation109_spill] sm:$0xff] }
 0x370   : > { %v1829_v34 = vadd.f32 %v4099_v20, %v4912_v62  ;;  %v1273_v51 = vadd.f32 %v1257_v7, %v4211_v52  ;;  %v1613_v27 = vadd.f32 %v1581_v49, %v1436_v8  ;;  %v1369_v52 = vsel %vm3410_vm2, %v1337_v48, 0.0  ;;  %v4917_v7 = vld [vmem:[#allocation104_spill] sm:$0xff]  ;;  %v4920_v8 = vld [vmem:[#allocation41_spill] sm:$0xff] }
 0x371   : > { %v1825_v13 = vadd.f32 %v4919_v57, %v4918_v9  ;;  %v1063_v17 = vadd.f32 %v4203_v33, %v4199_v0  ;;  %v4932_v0 = vld [vmem:[#allocation17_spill] sm:$0xff] }
 0x372   : > { %v1434_v42 = vadd.f32 %v1418_v41, %v1273_v51  ;;  %v2449_v41 = vunpack.i.h.bf16 %v4209_v58  ;;  %v4927_v58 = vld [vmem:[#allocation73_spill] sm:$0xff]  ;;  %v4928_v51 = vld [vmem:[#allocation28_spill] sm:$0xff] }
 0x37d   : > { %v1970_v39 = vpop.xlane.xlu1 %1969 }
 0x37e   : > { %v1986_v4 = vmul.f32 0.00390625, %v1970_v39  ;;  %v1677_v39 = vsel %vm1673_vm11, %v1634_v11, %v2448_v3  ;;  %v1792_v11 = vpop.permute.xlu0 %1791  ;;  %v1708_v3 = vsel %vm3464_vm7, %v1676_v23, 0.0 }
 0x37f   : > { %v1709_v18 = vsel %vm3439_vm5, %v1677_v39, 0.0  ;;  %v4924_v39 = vld [vmem:[#allocation23_spill] sm:$0xff] }
 0x380   : > { %v2002_v29 = vmul.f32 %v4306_v55, %v1986_v4  ;;  %v1759_v4 = vmul.f32 %v4914_v15, %v1711_v30  ;;  %v1757_v5 = vmul.f32 %v4920_v8, %v1709_v18  ;;  %v4925_v30 = vunpack.i.l.bf16 %v4924_v39 }
 0x381   : > { %v1816_v43 = vpop.permute.xlu1 %1815 }
 0x382   : > { %v2013_v61 = vsel %vm2007_vm12, %v2002_v29, 0.0  ;;  %v1833_v46 = vadd.f32 %v1816_v43, %v1785_v26  ;;  %v1832_v12 = vadd.f32 %v1816_v43, %v1784_v45  ;;  %v1827_v26 = vadd.f32 %v4916_v1, %v4915_v2 }
 0x383   : > { %v4332_v59 = vadd.f32 %v2013_v61, %v4015_v44  ;;  %v1580_v44 = vsel %vm1576_vm10, %v4252_v14, %v1539_v63  ;;  %v1828_v63 = vadd.f32 %v4099_v20, %v4913_v60  ;;  %v1758_v20 = vmul.f32 %v4914_v15, %v1710_v40  ;;  %v4926_v40 = vld [vmem:[#allocation85_spill] sm:$0xff] }
 0x384   : > { %1861 = vmatprep.subr.mxu0 %v1833_v46  ;;  %v1612_v56 = vadd.f32 %v1580_v44, %v1435_v53  ;;  %v1826_v29 = vadd.f32 %v4916_v1, %v4917_v7  ;;  %v1775_v43 = vadd.f32 %v1759_v4, %v1614_v16  ;;  %v1824_v61 = vadd.f32 %v4919_v57, %v4921_v6  ;;  %v1628_v44 = vpop.permute.xlu0 %1627 }
 0x385   : > { %v1796_v54 = vpop.permute.xlu1 %1795  ;;  %1862 = vmatpush1.msra.mxu0 %v1832_v12  ;;  %v1756_v46 = vmul.f32 %v4920_v8, %v1708_v3  ;;  %v1774_v12 = vadd.f32 %v1758_v20, %v1613_v27  ;;  %v1256_v53 = vmul.f32 %v4922_v38, %v1208_v50  ;;  %v1417_v50 = vmul.f32 %v4926_v40, %v1369_v52  ;;  %v4929_v27 = vld [vmem:[#allocation27_spill] sm:$0xff] }
 0x386   : > { %1863 = vmatprep.subr.mxu0 %v1831_v36  ;;  %v1773_v36 = vadd.f32 %v1757_v5, %v1612_v56  ;;  %v1823_v49 = vadd.f32 %v1796_v54, %v1775_v43  ;;  %v638_v60 = vsel %vm637_vm6, %v4929_v27, %v4928_v51  ;;  %v1675_v1 = vsel %vm1673_vm11, %v1628_v44, %v2449_v41  ;;  %v4418_v5 = vld [vmem:[%s2615_s24] sm:$0xff]  ;;  %v1997_v51 = vld [vmem:[%s4521_s4 + $0x30] sm:$0xff] }
 0x387   : > { %1864 = vmatpush1.msra.mxu0 %v1830_v31  ;;  %v1822_v23 = vadd.f32 %v1796_v54, %v1774_v12  ;;  %v4931_v54 = vunpack.i.l.bf16 %v4867_v32  ;;  %v1272_v2 = vadd.f32 %v1256_v53, %v1063_v17  ;;  %v1707_v57 = vsel %vm3439_vm5, %v1675_v1, 0.0  ;;  %v1995_v17 = vld [vmem:[%s4521_s4 + $0x20] sm:$0xff] }
 0x388   : > { %1865 = vmatprep.subr.mxu0 %v1829_v34  ;;  %v1821_v62 = vadd.f32 %v1792_v11, %v1773_v36  ;;  %v413_v34 = vsel %vm3417_vm3, %v4927_v58, 0.0  ;;  %v1046_v43 = vmul.f32 %v4418_v5, %v4887_v10  ;;  %v1755_v6 = vmul.f32 %v4197_v25, %v1707_v57  ;;  %v1998_v58 = vld [vmem:[%s4521_s4 + $0x38] sm:$0xff]  ;;  %v1835_v57 = vld [vmem:[%s4520_s3] sm:$0xf] }
 0x389   : > { %v1535_v45 = vpop.permute.xlu1 %1534  ;;  %1866 = vmatpush1.msra.mxu0 %v1828_v63  ;;  %v4930_v63 = vld [vmem:[#allocation63_spill] sm:$0xff]  ;;  %v477_v33 = vmul.f32 %v4932_v0, %v413_v34  ;;  %v1433_v20 = vadd.f32 %v1417_v50, %v1272_v2 }
 0x38a   : > { %v1579_v19 = vsel %vm1576_vm10, %v1535_v45, %v4252_v14  ;;  %1867 = vmatprep.subr.mxu0 %v1827_v26  ;;  %v4923_v14 = vld [vmem:[#allocation24_spill] sm:$0xff]  ;;  %v902_v18 = vsel %vm901_vm4, %v4931_v54, %v4930_v63  ;;  %v4933_v26 = vld [vmem:[#allocation57_spill] sm:$0xff] }
 0x38b   : > { %v1611_v24 = vadd.f32 %v1579_v19, %v1434_v42  ;;  %1868 = vmatpush1.msra.mxu0 %v1826_v29  ;;  %v741_v31 = vsel %vm740_vm1, %v4925_v30, %v4923_v14  ;;  %v670_v52 = vadd.f32 %v638_v60, %v477_v33  ;;  %v934_v32 = vsel %vm3417_vm3, %v902_v18, 0.0  ;;  %v4934_v29 = vld [vmem:[#allocation97_spill] sm:$0xff]  ;;  %v4935_v42 = vld [vmem:[#allocation76_spill] sm:$0xff] }
 0x38c   : > { %1869 = vmatprep.subr.mxu0 %v1825_v13  ;;  %v773_v4 = vsel %vm3464_vm7, %v741_v31, 0.0  ;;  %v982_v7 = vmul.f32 %v4881_v21, %v934_v32  ;;  %v1175_v45 = vsel %vm1174_vm8, %v4934_v29, %v4901_v22  ;;  %v1336_v9 = vsel %vm1335_vm9, %v4935_v42, %v4017_v35  ;;  %v4936_v29 = vld [vmem:[#allocation39_spill] sm:$0xff]  ;;  %v4937_v42 = vld [vmem:[#allocation89_spill] sm:$0xff] }
 0x38d   : > { %v1772_v48 = vadd.f32 %v1756_v46, %v1611_v24  ;;  %v1531_v16 = vpop.permute.xlu1 %1530  ;;  %1870 = vmatpush1.msra.mxu0 %v1824_v61  ;;  %v821_v56 = vmul.f32 %v4933_v26, %v773_v4  ;;  %v1207_v21 = vsel %vm3464_vm7, %v1175_v45, 0.0  ;;  %v1368_v22 = vsel %vm3417_vm3, %v1336_v9, 0.0 }
 0x38e   : > { %1871 = vmatprep.subr.mxu0 %v1823_v49  ;;  %v1255_v47 = vmul.f32 %v4922_v38, %v1207_v21  ;;  %v1416_v12 = vmul.f32 %v4926_v40, %v1368_v22  ;;  %v1996_v40 = vld [vmem:[%s4521_s4 + $0x28] sm:$0xff] }
 0x38f   : > { %1872 = vmatpush1.msra.mxu0 %v1822_v23  ;;  %v1820_v15 = vadd.f32 %v1792_v11, %v1772_v48  ;;  %v837_v8 = vadd.f32 %v821_v56, %v670_v52 }
 0x390   : > { %1873 = vmatprep.subr.mxu0 %v1821_v62 }
 0x391   : > { %v1533_v3 = vpop.permute.xlu1 %1532  ;;  %1874 = vmatpush1.msra.mxu0 %v1820_v15  ;;  %v998_v35 = vadd.f32 %v982_v7, %v837_v8 }
 0x392   : > { %v1578_v11 = vsel %vm1576_vm10, %v1531_v16, %v1533_v3 }
 0x393   : > { %v1610_v13 = vadd.f32 %v1578_v11, %v1433_v20  ;;  %v1062_v46 = vadd.f32 %v1046_v43, %v998_v35  ;;  %v1834_v11 = vld [vmem:[%s4519_s2] sm:$0xf] }
 0x395   : > { %v1626_v19 = vpop.permute.xlu1 %1625  ;;  %v1771_v61 = vadd.f32 %v1755_v6, %v1610_v13  ;;  %v1271_v41 = vadd.f32 %v1255_v47, %v1062_v46  ;;  %v4938_v13 = vld [vmem:[#allocation42_spill] sm:$0xff] }
 0x396   : > { %v1674_v24 = vsel %vm1673_vm11, %v1626_v19, %v1628_v44  ;;  %v1973_v23 = vpop.xlane.xlu0 %1972  ;;  %v4939_v19 = vmov 2  }
 0x397   : > { %v1706_v36 = vsel %vm3464_vm7, %v1674_v24, 0.0  ;;  %v1432_v49 = vadd.f32 %v1416_v12, %v1271_v41  ;;  %v1987_v44 = vmul.f32 0.00390625, %v1973_v23 }
 0x398   : > { %v1754_v39 = vmul.f32 %v4197_v25, %v1706_v36 }
 0x399   : > { %v1788_v53 = vpop.permute.xlu1 %1787 }
 0x39a   : > { %v1819_v10 = vadd.f32 %v1788_v53, %v1771_v61  ;;  %v1976_v48 = vpop.xlane.xlu0 %1975 }
 0x39b   : > { %v1988_v28 = vmul.f32 0.00390625, %v1976_v48 }
 0x39c   : > { %1875 = vmatprep.subr.mxu0 %v1819_v10 }
 0x39d   : > { %v1529_v37 = vpop.permute.xlu1 %1528  ;;  %v2004_v62 = vmul.f32 %v1996_v40, %v1988_v28 }
 0x39e   : > { %v1577_v14 = vsel %vm1576_vm10, %v1529_v37, %v1531_v16  ;;  %v1982_v50 = vpop.xlane.xlu0 %1981  ;;  %v2003_v16 = vmul.f32 %v1995_v17, %v1987_v44 }
 0x39f   : > { %v1609_v38 = vadd.f32 %v1577_v14, %v1432_v49  ;;  %v1990_v25 = vmul.f32 0.00390625, %v1982_v50  ;;  %v2017_v60 = vsel %vm2007_vm12, %v2004_v62, 0.0 }
 0x3a0   : > { %v2015_v34 = vsel %vm2007_vm12, %v2003_v16, 0.0 }
 0x3a1   : > { %v1770_v30 = vadd.f32 %v1754_v39, %v1609_v38  ;;  %v2006_v54 = vmul.f32 %v1998_v58, %v1990_v25  ;;  %v2016_v18 = vadd.f32 %v2015_v34, %v4332_v59 }
 0x3a3   : > { %v1818_v31 = vadd.f32 %v1788_v53, %v1770_v30  ;;  %v2018_v0 = vadd.f32 %v2017_v60, %v2016_v18  ;;  %v2021_v4 = vsel %vm2007_vm12, %v2006_v54, 0.0 }
 0x3a5   : > { %1876 = vmatpush1.msra.mxu0 %v1818_v31  ;;  %v1939_v31 = vld [vmem:[%s4520_s3] sm:$0x1] }
 0x3a6   : > { %2266 = vmatmul.mubr.msk.f32.vlgmr.msra.gmra.mxu0 %vm1841_vm13, %v1834_v11 }
 0x3ce   : > { %v1979_v27 = vpop.xlane.xlu1 %1978 }
 0x3cf   : > { %v1989_v63 = vmul.f32 0.00390625, %v1979_v27 }
 0x3d1   : > { %v2005_v15 = vmul.f32 %v1997_v51, %v1989_v63 }
 0x3d3   : > { %v2019_v33 = vsel %vm2007_vm12, %v2005_v15, 0.0 }
 0x3d4   : > { %v2020_v2 = vadd.f32 %v2019_v33, %v2018_v0 }
 0x3d6   : > { %v2022_v1 = vadd.f32 %v2021_v4, %v2020_v2 }
 0x3d8   : > { %v2023_v26 = vrot.slane %v2022_v1, 4 }
 0x3da   : > { %v2024_v56 = vadd.f32 %v2023_v26, %v2022_v1 }
 0x3dc   : > { %v2025_v3 = vrot.slane %v2024_v56, 2 }
 0x3de   : > { %v2026_v52 = vadd.f32 %v2025_v3, %v2024_v56 }
 0x3e0   : > { %v2027_v32 = vrot.slane %v2026_v52, 1 }
 0x3e2   : > { %v2028_v20 = vadd.f32 %v2027_v32, %v2026_v52 }
 0x3e4   : > { %v2029_v59 = vmax.f32 %v2028_v20, 0.0 }
 0x3e6   : > { %2031 = vrot.lane.b32.xlu0 %v2029_v59, %s2562_s15 }
 0x458   : > { %v2032_v7 = vpop.permute.xlu0 %2031 }
 0x459   : > { %v2036_v45 = vmul.f32 %v2032_v7, %v4936_v29  ;;  %v2034_v9 = vmul.f32 %v2032_v7, %v4937_v42  ;;  %v2035_v8 = vmul.f32 %v2032_v7, %v4938_v13  ;;  %v2037_v43 = vmul.f32 %v2032_v7, %v4306_v55 }
 0x45a   : > { %v2038_v21 = vmul.f32 %v2032_v7, %v1995_v17  ;;  %v2039_v22 = vmul.f32 %v2032_v7, %v1996_v40  ;;  %v2040_v6 = vmul.f32 %v2032_v7, %v1997_v51  ;;  %v2041_v35 = vmul.f32 %v2032_v7, %v1998_v58 }
 0x45b   : > { %2054 = vrot.lane.b32.xlu1 %v2036_v45, %s2563_s16  ;;  %2050 = vrot.lane.b32.xlu0 %v2034_v9, %s2563_s16 }
 0x45f   : > { %2052 = vrot.lane.b32.xlu0 %v2035_v8, %s2563_s16  ;;  %1838 = vperm.xlu1 %2451, %v1835_v57  }
 0x463   : > { %2056 = vrot.lane.b32.xlu0 %v2037_v43, %s2563_s16  ;;  %2453 = vset.pattern.permute.xlu1 %v4939_v19 }
 0x466   : > { %v1911_v23 = vpop.f32.mrf.mxu0 }
 0x467   : > { %2058 = vrot.lane.b32.xlu0 %v2038_v21, %s2563_s16 }
 0x468   : > { %v1913_v44 = vpop.f32.mrf.mxu0 }
 0x46b   : > { %2060 = vrot.lane.b32.xlu0 %v2039_v22, %s2563_s16 }
 0x46f   : > { %2062 = vrot.lane.b32.xlu0 %v2040_v6, %s2563_s16 }
 0x473   : > { %2064 = vrot.lane.b32.xlu0 %v2041_v35, %s2563_s16 }
 0x477   : > { %1919 = vperm.xlu0 %2452, %v1835_v57  }
 0x47b   : > { %2454 = vset.pattern.permute.xlu0 %v4939_v19 }
 0x4cd   : > { %v2051_v47 = vpop.permute.xlu0 %2050  ;;  %v2055_v46 = vpop.permute.xlu1 %2054 }
 0x4ce   : > { %v2074_v61 = vsel %vm2007_vm12, %v2051_v47, 0.0  ;;  %v2080_v12 = vsel %vm2007_vm12, %v2055_v46, 0.0 }
 0x4cf   : > { %2075 = vadd.xlane.f32.xlu1 %v2074_v61 }
 0x4d1   : > { %v2053_v55 = vpop.permute.xlu0 %2052 }
 0x4d2   : > { %v2077_v24 = vsel %vm2007_vm12, %v2053_v55, 0.0 }
 0x4d3   : > { %2081 = vadd.xlane.f32.xlu1 %v2080_v12  ;;  %2078 = vadd.xlane.f32.xlu0 %v2077_v24 }
 0x4d5   : > { %v2057_v53 = vpop.permute.xlu0 %2056 }
 0x4d6   : > { %v2083_v10 = vsel %vm2007_vm12, %v2057_v53, 0.0 }
 0x4d7   : > { %2084 = vadd.xlane.f32.xlu0 %v2083_v10 }
 0x4d9   : > { %v2059_v41 = vpop.permute.xlu0 %2058 }
 0x4da   : > { %v2086_v36 = vsel %vm2007_vm12, %v2059_v41, 0.0  ;;  %v1839_v48 = vpop.permute.xlu1 %1838 }
 0x4db   : > { %2087 = vadd.xlane.f32.xlu1 %v2086_v36  ;;  %v1912_v17 = vadd.f32 %v1911_v23, %v1839_v48  ;;  %v1914_v28 = vadd.f32 %v1913_v44, %v1839_v48  ;;  %v4940_v44 = vlaneseq }
 0x4dd   : > { %v2061_v37 = vpop.permute.xlu0 %2060  ;;  %v1916_v40 = vmax.f32 %v1912_v17, 0.0  ;;  %v1917_v50 = vmax.f32 %v1914_v28, 0.0  ;;  %v2147_v17 = vshrl.u32 %v4940_v44, 7 }
 0x4de   : > { %v2089_v49 = vsel %vm2007_vm12, %v2061_v37, 0.0 }
 0x4df   : > { %2090 = vadd.xlane.f32.xlu0 %v2089_v49 }
 0x4e1   : > { %v2063_v14 = vpop.permute.xlu0 %2062 }
 0x4e2   : > { %v2092_v39 = vsel %vm2007_vm12, %v2063_v14, 0.0 }
 0x4e3   : > { %2093 = vadd.xlane.f32.xlu1 %v2092_v39 }
 0x4e5   : > { %v2065_v38 = vpop.permute.xlu0 %2064 }
 0x4e6   : > { %v2095_v30 = vsel %vm2007_vm12, %v2065_v38, 0.0 }
 0x4e7   : > { %2096 = vadd.xlane.f32.xlu0 %v2095_v30 }
 0x4f2   : > { %v1920_v16 = vpop.permute.xlu0 %1919 }
 0x4f3   : > { %v1922_v62 = vmul.f32 %v1920_v16, %v1916_v40  ;;  %v1923_v25 = vmul.f32 %v1920_v16, %v1917_v50  ;;  %v2148_v40 = vsub.s32 0, %v2147_v17 }
 0x4f4   : > { %1942 = vperm.xlu1 %2453, %v1939_v31  }
 0x4f5   : > { %v1925_v58 = vsel %vm1924_vm14, %v1922_v62, 0.0  ;;  %v1932_v34 = vsel %vm1924_vm14, %v1923_v25, 0.0 }
 0x4f6   : > { %v1926_v51 = vrot.slane %v1925_v58, 4  ;;  %v1933_v27 = vrot.slane %v1932_v34, 4 }
 0x4f8   : > { %v1927_v63 = vadd.f32 %v1926_v51, %v1925_v58  ;;  %v1934_v54 = vadd.f32 %v1933_v27, %v1932_v34 }
 0x4fa   : > { %v1928_v15 = vrot.slane %v1927_v63, 2  ;;  %v1935_v0 = vrot.slane %v1934_v54, 2 }
 0x4fc   : > { %v1929_v4 = vadd.f32 %v1928_v15, %v1927_v63  ;;  %v1936_v2 = vadd.f32 %v1935_v0, %v1934_v54 }
 0x4fe   : > { %v1930_v52 = vrot.slane %v1929_v4, 1  ;;  %v1937_v32 = vrot.slane %v1936_v2, 1 }
 0x500   : > { %v1931_v42 = vadd.f32 %v1930_v52, %v1929_v4  ;;  %v1938_v9 = vadd.f32 %v1937_v32, %v1936_v2 }
 0x558   : > { %v2076_v60 = vpop.xlane.xlu1 %2075 }
 0x559   : > { %v2269_v56 = vmul.f32 -1.442695, %v2076_v60 }
 0x55b   : > { %2455 = vpow2.f32 %v2269_v56 }
 0x55c   : > { %v2079_v18 = vpop.xlane.xlu0 %2078  ;;  %v2082_v33 = vpop.xlane.xlu1 %2081 }
 0x55d   : > { %v2271_v3 = vmul.f32 -1.442695, %v2082_v33  ;;  %v2270_v20 = vmul.f32 -1.442695, %v2079_v18 }
 0x55f   : > { %2457 = vpow2.f32 %v2271_v3 }
 0x560   : > { %v2085_v1 = vpop.xlane.xlu0 %2084  ;;  %2459 = vpow2.f32 %v2270_v20 }
 0x561   : > { %v2272_v7 = vmul.f32 -1.442695, %v2085_v1 }
 0x563   : > { %2461 = vpow2.f32 %v2272_v7 }
 0x564   : > { %v2088_v26 = vpop.xlane.xlu1 %2087 }
 0x565   : > { %v2273_v29 = vmul.f32 -1.442695, %v2088_v26 }
 0x567   : > { %2463 = vpow2.f32 %v2273_v29  ;;  %v2521_v29 = vld [vmem:[%s2615_s24 + $0x10] sm:$0xff] }
 0x568   : > { %v2091_v11 = vpop.xlane.xlu0 %2090  ;;  %v2456_v35 = vpop.eup %2455 }
 0x569   : > { %v2274_v45 = vmul.f32 -1.442695, %v2091_v11  ;;  %v2122_v55 = vadd.f32 1.0, %v2456_v35 }
 0x56b   : > { %2465 = vpow2.f32 %v2274_v45 }
 0x56c   : > { %v2094_v59 = vpop.xlane.xlu1 %2093  ;;  %v2458_v47 = vpop.eup %2457 }
 0x56d   : > { %v2275_v57 = vmul.f32 -1.442695, %v2094_v59  ;;  %v2460_v61 = vpop.eup %2459  ;;  %v2124_v24 = vadd.f32 1.0, %v2458_v47  ;;  %v2520_v59 = vld [vmem:[%s2615_s24 + $0x8] sm:$0xff] }
 0x56e   : > { %v2123_v10 = vadd.f32 1.0, %v2460_v61  ;;  %v2528_v47 = vld [vmem:[%s2615_s24 + $0x48] sm:$0xff] }
 0x56f   : > { %2467 = vpow2.f32 %v2275_v57  ;;  %v2523_v57 = vld [vmem:[%s2615_s24 + $0x20] sm:$0xff] }
 0x570   : > { %v1943_v13 = vpop.permute.xlu1 %1942  ;;  %v2097_v22 = vpop.xlane.xlu0 %2096 }
 0x571   : > { %v1945_v8 = vadd.f32 %v1943_v13, %v1931_v42  ;;  %v1946_v43 = vadd.f32 %v1943_v13, %v1938_v9  ;;  %v2276_v6 = vmul.f32 -1.442695, %v2097_v22  ;;  %v2462_v46 = vpop.eup %2461  ;;  %v2522_v42 = vld [vmem:[%s2615_s24 + $0x18] sm:$0xff] }
 0x572   : > { %v2125_v49 = vadd.f32 1.0, %v2462_v46 }
 0x573   : > { %v2267_v19 = vmul.f32 -1.442695, %v1945_v8  ;;  %v2268_v21 = vmul.f32 -1.442695, %v1946_v43  ;;  %v2524_v8 = vld [vmem:[%s2615_s24 + $0x28] sm:$0xff] }
 0x574   : > { %v2464_v12 = vpop.eup %2463 }
 0x575   : > { %2469 = vpow2.f32 %v2267_v19  ;;  %v2126_v39 = vadd.f32 1.0, %v2464_v12  ;;  %v2525_v19 = vld [vmem:[%s2615_s24 + $0x30] sm:$0xff] }
 0x576   : > { %2471 = vpow2.f32 %v2268_v21 }
 0x577   : > { %2473 = vpow2.f32 %v2276_v6  ;;  %v2527_v6 = vld [vmem:[%s2615_s24 + $0x40] sm:$0xff] }
 0x578   : > { %v2466_v53 = vpop.eup %2465  ;;  %2475 = vrcp.f32 %v2122_v55  ;;  %v2529_v55 = vld [vmem:[%s2615_s24 + $0x50] sm:$0xff] }
 0x579   : > { %2477 = vrcp.f32 %v2124_v24  ;;  %v2127_v30 = vadd.f32 1.0, %v2466_v53  ;;  %v2530_v24 = vld [vmem:[%s2615_s24 + $0x58] sm:$0xff] }
 0x57a   : > { %2479 = vrcp.f32 %v2123_v10  ;;  %v2531_v10 = vld [vmem:[%s2615_s24 + $0x60] sm:$0xff] }
 0x57c   : > { %v2468_v41 = vpop.eup %2467 }
 0x57d   : > { %v2128_v31 = vadd.f32 1.0, %v2468_v41 }
 0x582   : > { %v2470_v36 = vpop.eup %2469 }
 0x583   : > { %v2472_v37 = vpop.eup %2471  ;;  %v1953_v14 = vadd.f32 1.0, %v2470_v36  ;;  %v2532_v36 = vld [vmem:[%s2615_s24 + $0x68] sm:$0xff] }
 0x584   : > { %v1954_v38 = vadd.f32 1.0, %v2472_v37  ;;  %v2474_v23 = vpop.eup %2473 }
 0x585   : > { %2481 = vrcp.f32 %v1953_v14  ;;  %v2129_v48 = vadd.f32 1.0, %v2474_v23  ;;  %v2476_v28 = vpop.eup %2475 }
 0x586   : > { %2483 = vrcp.f32 %v1954_v38  ;;  %v2478_v50 = vpop.eup %2477 }
 0x587   : > { %2485 = vrcp.f32 %v2125_v49  ;;  %v2480_v16 = vpop.eup %2479 }
 0x588   : > { %2487 = vrcp.f32 %v2126_v39  ;;  %v2533_v39 = vld [vmem:[%s2615_s24 + $0x70] sm:$0xff] }
 0x589   : > { %2489 = vrcp.f32 %v2127_v30  ;;  %v2534_v30 = vld [vmem:[%s2615_s24 + $0x78] sm:$0xff] }
 0x58a   : > { %2491 = vrcp.f32 %v2128_v31 }
 0x58b   : > { %2493 = vrcp.f32 %v2129_v48 }
 0x592   : > { %v2482_v62 = vpop.eup %2481 }
 0x593   : > { %v2484_v25 = vpop.eup %2483  ;;  %v2149_v58 = vrot.slane %v2482_v62, %v2148_v40 }
 0x594   : > { %v2486_v34 = vpop.eup %2485  ;;  %v2153_v51 = vrot.slane %v2484_v25, %v2148_v40 }
 0x595   : > { %v2488_v27 = vpop.eup %2487  ;;  %v2154_v60 = vadd.f32 %v2476_v28, %v2149_v58  ;;  %v2156_v63 = vadd.f32 %v2480_v16, %v2149_v58  ;;  %v2158_v54 = vadd.f32 %v2478_v50, %v2149_v58  ;;  %v2160_v18 = vadd.f32 %v2486_v34, %v2149_v58 }
 0x596   : > { %v2490_v15 = vpop.eup %2489  ;;  %v2155_v0 = vadd.f32 %v2476_v28, %v2153_v51  ;;  %v2157_v33 = vadd.f32 %v2480_v16, %v2153_v51  ;;  %v2159_v4 = vadd.f32 %v2478_v50, %v2153_v51  ;;  %v2161_v2 = vadd.f32 %v2486_v34, %v2153_v51 }
 0x597   : > { %v2492_v1 = vpop.eup %2491  ;;  %v2162_v26 = vadd.f32 %v2488_v27, %v2149_v58  ;;  %v2163_v56 = vadd.f32 %v2488_v27, %v2153_v51  ;;  %v2164_v3 = vadd.f32 %v2490_v15, %v2149_v58  ;;  %v2165_v52 = vadd.f32 %v2490_v15, %v2153_v51 }
 0x598   : > { %v2166_v32 = vadd.f32 %v2492_v1, %v2149_v58  ;;  %v2167_v20 = vadd.f32 %v2492_v1, %v2153_v51  ;;  %v2170_v11 = vmul.f32 %v4418_v5, %v2154_v60  ;;  %v2171_v7 = vmul.f32 %v2520_v59, %v2155_v0  ;;  %v2526_v5 = vld [vmem:[%s2615_s24 + $0x38] sm:$0xff]  ;;  %v2494_v46 = vpop.eup %2493 }
 0x599   : > { %v2172_v45 = vmul.f32 %v2521_v29, %v2156_v63  ;;  %v2173_v9 = vmul.f32 %v2522_v42, %v2157_v33  ;;  %v2174_v13 = vmul.f32 %v2523_v57, %v2158_v54  ;;  %v2175_v43 = vmul.f32 %v2524_v8, %v2159_v4 }
 0x59a   : > { %v2176_v21 = vmul.f32 %v2525_v19, %v2160_v18  ;;  %v2177_v22 = vmul.f32 %v2526_v5, %v2161_v2  ;;  %v2178_v35 = vmul.f32 %v2527_v6, %v2162_v26  ;;  %v2179_v61 = vmul.f32 %v2528_v47, %v2163_v56  ;;  %2186 = vst [vmem:[%s4480_s28] sm:$0xff] %v2170_v11 }
 0x59b   : > { %2187 = vst [vmem:[%s4480_s28 + $0x8] sm:$0xff] %v2171_v7  ;;  %v2180_v12 = vmul.f32 %v2529_v55, %v2164_v3  ;;  %v2181_v53 = vmul.f32 %v2530_v24, %v2165_v52  ;;  %v2182_v41 = vmul.f32 %v2531_v10, %v2166_v32  ;;  %v2183_v37 = vmul.f32 %v2532_v36, %v2167_v20 }
 0x59c   : > { %2188 = vst [vmem:[%s4480_s28 + $0x10] sm:$0xff] %v2172_v45  ;;  %2189 = vst [vmem:[%s4480_s28 + $0x18] sm:$0xff] %v2173_v9  ;;  %v2168_v49 = vadd.f32 %v2494_v46, %v2149_v58  ;;  %v2169_v14 = vadd.f32 %v2494_v46, %v2153_v51 }
 0x59d   : > { %2190 = vst [vmem:[%s4480_s28 + $0x20] sm:$0xff] %v2174_v13  ;;  %2191 = vst [vmem:[%s4480_s28 + $0x28] sm:$0xff] %v2175_v43 }
 0x59e   : > { %2192 = vst [vmem:[%s4480_s28 + $0x30] sm:$0xff] %v2176_v21  ;;  %2193 = vst [vmem:[%s4480_s28 + $0x38] sm:$0xff] %v2177_v22  ;;  %v2184_v38 = vmul.f32 %v2533_v39, %v2168_v49  ;;  %v2185_v31 = vmul.f32 %v2534_v30, %v2169_v14 }
 0x59f   : > { %2194 = vst [vmem:[%s4480_s28 + $0x40] sm:$0xff] %v2178_v35  ;;  %2195 = vst [vmem:[%s4480_s28 + $0x48] sm:$0xff] %v2179_v61 }
 0x5a0   : > { %2196 = vst [vmem:[%s4480_s28 + $0x50] sm:$0xff] %v2180_v12  ;;  %2197 = vst [vmem:[%s4480_s28 + $0x58] sm:$0xff] %v2181_v53 }
 0x5a1   : > { %2198 = vst [vmem:[%s4480_s28 + $0x60] sm:$0xff] %v2182_v41  ;;  %2199 = vst [vmem:[%s4480_s28 + $0x68] sm:$0xff] %v2183_v37 }
 0x5a2   : > { %2200 = vst [vmem:[%s4480_s28 + $0x70] sm:$0xff] %v2184_v38  ;;  %2201 = vst [vmem:[%s4480_s28 + $0x78] sm:$0xff] %v2185_v31 }
 0x5a3 PF: > { %s15_s18 = sadd.s32 1, %s2541_s18  }
 0x5a4   : > { %p12_p4 = scmp.ge.s32.totalorder %s15_s18, 4  }
 0x5a6   :  { %14 = sbr.rel (!%p12_p4) target bundleno = 1 (0x1), region = 70 }

</bundles_post_ra>
